<compile_context>
chip_gen: v7x
topology: tpu7x:2x2x1
jax: 0.10.0
libtpu: 0.0.40
codegen_flags: <defaults>
</compile_context>

<pallas_src>
import jax
import jax.numpy as jnp
from jax import lax
from jax.experimental import pallas as pl
from jax.experimental.pallas import tpu as pltpu

HIDDEN = 50          # logical hidden size (PyTorch)
HIDDEN_PAD = 64      # sublane-friendly padded hidden size
GATES = 4
GATE_PAD = GATES * HIDDEN_PAD   # 256, lane-aligned fused gate width
INPUT = 1


def _sigmoid_tanh(z):
    # sigmoid(z) == 0.5 * tanh(0.5 * z) + 0.5  -> exactly one EUP op per gate.
    return 0.5 * jnp.tanh(0.5 * z) + 0.5


def lstm_linear_kernel(x_ref, w_ih_ref, w_hh_ref, b_ref, w_out_ref, b_out_ref,
                       out_ref, h_all_scr):
    # x_ref:     (S, BP, 1)   time-major input (batch zero-padded to BP)
    # w_ih_ref:  (1, GP) f32  fused input weights (gate-major, each gate zero-padded to HP)
    # w_hh_ref:  (HP, GP) bf16 fused recurrent weights, transposed for right-mul (h @ W)
    # b_ref:     (1, GP) f32  fused bias (b_ih + b_hh), zero in padded lanes
    # w_out_ref: (1, HP) f32  Linear(50 -> 1) weight, zero in padded lanes
    # b_out_ref: (1, 1)  f32  Linear bias
    # out_ref:   (S, BP) f32  per-timestep scalar prediction
    # h_all_scr: (S, BP, HP)  VMEM: per-step hidden states (f32)
    S, BP, _ = x_ref.shape
    HP = w_hh_ref.shape[0]

    # Loop-invariant reads hoisted out of the recurrence (w_hh is bf16 -> 8 vregs).
    w_hh = w_hh_ref[...]
    w_ih = w_ih_ref[...]
    b = b_ref[...]

    def step(t, carry):
        h, c = carry
        # Input projection recomputed per step (input_size == 1 => lane-broadcast FMA,
        # hidden under the matmul).  Zero-padded weight/bias lanes keep padded gate
        # lanes at exactly 0 so h/c padding stays 0 through the recurrence.
        xp = x_ref[t] * w_ih + b                                   # (BP, GP) f32
        pre = xp + jnp.dot(h.astype(jnp.bfloat16), w_hh,
                           preferred_element_type=jnp.float32)     # single-pass MXU
        i_g = _sigmoid_tanh(pre[:, 0 * HP:1 * HP])
        f_g = _sigmoid_tanh(pre[:, 1 * HP:2 * HP])
        g_g = jnp.tanh(pre[:, 2 * HP:3 * HP])
        o_g = _sigmoid_tanh(pre[:, 3 * HP:4 * HP])
        c_new = f_g * c + i_g * g_g
        h_new = o_g * jnp.tanh(c_new)
        h_all_scr[t] = h_new                 # full-width store; Linear deferred to after loop
        return (h_new, c_new)

    h0 = jnp.zeros((BP, HP), jnp.float32)
    c0 = jnp.zeros((BP, HP), jnp.float32)
    if S <= 16 and BP <= 16:
        unroll = True                        # tiny shapes: fully unroll for LLO visibility
    elif BP >= 64:
        unroll = 2                           # large batch: back off to avoid vreg spills
    else:
        unroll = 4
    lax.fori_loop(0, S, step, (h0, c0), unroll=unroll)

    # Linear(50 -> 1) over all timesteps at once (padded lanes of w_out are zero) and a
    # single dense store instead of S masked width-1 stores.
    y = jnp.sum(h_all_scr[...] * w_out_ref[...], axis=-1) + b_out_ref[...]
    out_ref[...] = y.astype(out_ref.dtype)


def _pad_up(n, m):
    return -(-n // m) * m


def _vmem_bytes_estimate(S, BP):
    """Rough padded-tile VMEM estimate (double-buffered I/O + scratch)."""
    lane = 128
    x_b = S * _pad_up(BP, 8) * lane * 4                       # (S, BP, 1) f32, lane-padded
    out_b = _pad_up(S, 8) * _pad_up(BP, lane) * 4              # (S, BP) f32
    h_all = S * _pad_up(BP, 8) * _pad_up(HIDDEN_PAD, lane) * 4  # scratch slab
    weights = (2 * 8 * GATE_PAD * 4                            # w_ih, b  (1, GP) f32
               + HIDDEN_PAD * GATE_PAD * 2                     # w_hh bf16
               + 2 * 8 * lane * 4)                             # w_out, b_out
    return 2 * (x_b + out_b + weights) + h_all


def track_model_forward(x, packed_params):
    """x: (B, S, 1) float32 (batch_first, as in PyTorch). Returns (B, S, 1)."""
    w_ih, w_hh, b, w_out, b_out = packed_params
    B, S, _ = x.shape
    BP = max(8, -(-B // 8) * 8)                          # pad batch to sublane multiple
    x_tm = jnp.transpose(x, (1, 0, 2))                   # (S, B, 1) time-major
    x_tm = jnp.pad(x_tm, ((0, 0), (0, BP - B), (0, 0)))  # (S, BP, 1)

    def full_spec(shape):
        return pl.BlockSpec(shape, lambda i, _n=len(shape): (0,) * _n)

    # Only raise the scoped-VMEM limit when the resident slabs approach v5e's 16 MiB
    # default; at small shapes leave the compiler default alone.
    est = _vmem_bytes_estimate(S, BP)
    vmem_limit = None
    if est >= 12 * (1 << 20):
        vmem_limit = min(int(1.5 * est) + (4 << 20), 48 << 20)

    # TODO(synk): for long S / large B, tile S via the grid (h/c in persistent scratch,
    # init under pl.when(pid==0)), drop x's size-1 lane dim in favor of a lane-dense
    # layout, add a 'parallel' batch grid axis so v7x's two TensorCores each run half the
    # batch, and make the (S, BP) output lane-dense.  At these shapes the kernel is
    # per-step-latency bound and none of that pays off; batching more tracks per call
    # (larger B) is the cheap throughput lever since per-step latency is ~independent of
    # BP up to the MXU M dimension.
    out_tm = pl.pallas_call(
        lstm_linear_kernel,
        out_shape=jax.ShapeDtypeStruct((S, BP), jnp.float32),
        grid=(1,),
        in_specs=[full_spec((S, BP, 1)),
                  full_spec(w_ih.shape),
                  full_spec(w_hh.shape),
                  full_spec(b.shape),
                  full_spec(w_out.shape),
                  full_spec(b_out.shape)],
        out_specs=full_spec((S, BP)),
        scratch_shapes=[pltpu.VMEM((S, BP, HIDDEN_PAD), jnp.float32)],
        compiler_params=pltpu.CompilerParams(dimension_semantics=("arbitrary",),
                                             vmem_limit_bytes=vmem_limit),
    )(x_tm, w_ih, w_hh, b, w_out, b_out)
    return jnp.transpose(out_tm[:, :B], (1, 0))[..., None]   # back to (B, S, 1)


def init_params(key):
    """Raw params with PyTorch shapes: weight_ih_l0 (4H,1), weight_hh_l0 (4H,H),
       bias_ih/bias_hh (4H,), linear.weight (1,H), linear.bias (1,). Gate order i,f,g,o."""
    k = 1.0 / jnp.sqrt(jnp.float32(HIDDEN))
    ks = jax.random.split(key, 6)
    w_ih = jax.random.uniform(ks[0], (4 * HIDDEN, INPUT), minval=-k, maxval=k, dtype=jnp.float32)
    w_hh = jax.random.uniform(ks[1], (4 * HIDDEN, HIDDEN), minval=-k, maxval=k, dtype=jnp.float32)
    b_ih = jax.random.uniform(ks[2], (4 * HIDDEN,), minval=-k, maxval=k, dtype=jnp.float32)
    b_hh = jax.random.uniform(ks[3], (4 * HIDDEN,), minval=-k, maxval=k, dtype=jnp.float32)
    w_lin = jax.random.uniform(ks[4], (1, HIDDEN), minval=-k, maxval=k, dtype=jnp.float32)
    b_lin = jax.random.uniform(ks[5], (1,), minval=-k, maxval=k, dtype=jnp.float32)
    return (w_ih, w_hh, b_ih, b_hh, w_lin, b_lin)


def pack_params(raw):
    """Repack raw PyTorch-layout params into fused, padded, transposed kernel params.
       w_hh is stored as bfloat16 for single-pass MXU pushes (accumulation stays f32)."""
    w_ih, w_hh, b_ih, b_hh, w_lin, b_lin = raw
    H, HP, GP = HIDDEN, HIDDEN_PAD, GATE_PAD
    w_ih_f = jnp.zeros((1, GP), jnp.float32)
    w_hh_f = jnp.zeros((HP, GP), jnp.float32)
    b_f = jnp.zeros((1, GP), jnp.float32)
    w_out_f = jnp.zeros((1, HP), jnp.float32)
    for g in range(GATES):  # gate-major packing, each gate zero-padded H -> HP
        w_ih_f = w_ih_f.at[0, g * HP:g * HP + H].set(w_ih[g * H:(g + 1) * H, 0])
        w_hh_f = w_hh_f.at[:H, g * HP:g * HP + H].set(w_hh[g * H:(g + 1) * H, :].T)
        b_f = b_f.at[0, g * HP:g * HP + H].set(b_ih[g * H:(g + 1) * H] + b_hh[g * H:(g + 1) * H])
    w_out_f = w_out_f.at[0, :H].set(w_lin[0])
    b_out_f = b_lin.reshape(1, 1)
    return (w_ih_f, w_hh_f.astype(jnp.bfloat16), b_f, w_out_f, b_out_f)


def reference_forward(x, raw):
    """Pure-JAX f32 reference of the LSTM(1->50)+Linear(50->1) forward, from raw params."""
    w_ih, w_hh, b_ih, b_hh, w_lin, b_lin = raw
    B = x.shape[0]
    H = HIDDEN

    def cell(carry, x_t):                              # x_t: (B, 1)
        h, c = carry
        pre = x_t @ w_ih.T + h @ w_hh.T + b_ih + b_hh  # (B, 4H)
        i_g = jax.nn.sigmoid(pre[:, 0 * H:1 * H])
        f_g = jax.nn.sigmoid(pre[:, 1 * H:2 * H])
        g_g = jnp.tanh(pre[:, 2 * H:3 * H])
        o_g = jax.nn.sigmoid(pre[:, 3 * H:4 * H])
        c_new = f_g * c + i_g * g_g
        h_new = o_g * jnp.tanh(c_new)
        y = h_new @ w_lin.T + b_lin                    # (B, 1)
        return (h_new, c_new), y

    h0 = jnp.zeros((B, H), jnp.float32)
    c0 = jnp.zeros((B, H), jnp.float32)
    _, ys = lax.scan(cell, (h0, c0), jnp.transpose(x, (1, 0, 2)))  # (S, B, 1)
    return jnp.transpose(ys, (1, 0, 2))


# TODO(synk): Adam optimizer, MSELoss and the DataLoader in __init__/set_loader are
# training utilities, not part of the forward pass, and are intentionally omitted.

if __name__ == "__main__":
    key = jax.random.PRNGKey(0)
    kx, kp = jax.random.split(key)
    B, S = 2, 8
    x = jax.random.normal(kx, (B, S, 1), dtype=jnp.float32)
    raw = init_params(kp)
    packed = pack_params(raw)

    y = track_model_forward(x, packed)
    jax.block_until_ready(y)
    assert y.shape == (B, S, 1)

    # Tolerance accounts for the bf16 recurrent-matmul operands accumulating small error
    # across the S-step recurrence (re-validate at the longest production S before use).
    y_ref = reference_forward(x, raw)
    assert jnp.allclose(y, y_ref, atol=2e-2, rtol=2e-2), "mismatch vs JAX reference"

    print("KERNEL_OK")
</pallas_src>

<mosaic_0001>
module attributes {stable_mosaic.version = 11 : i64} {
  func.func @lstm_linear_kernel(%arg0: i32, %arg1: memref<8x8x1xf32, #tpu.memory_space<vmem>>, %arg2: memref<1x256xf32, #tpu.memory_space<vmem>>, %arg3: memref<64x256xbf16, #tpu.memory_space<vmem>>, %arg4: memref<1x256xf32, #tpu.memory_space<vmem>>, %arg5: memref<1x64xf32, #tpu.memory_space<vmem>>, %arg6: memref<1x1xf32, #tpu.memory_space<vmem>>, %arg7: memref<8x8xf32, #tpu.memory_space<vmem>>, %arg8: memref<8x8x64xf32, #tpu.memory_space<vmem>>) attributes {dimension_semantics = [#tpu.dimension_semantics<arbitrary>], iteration_bounds = array<i64: 1>, scalar_prefetch = 0 : i64, scratch_operands = 1 : i64, tpu.core_type = #tpu.core_type<tc>, window_params = [{pipeline_mode = #tpu.pipeline_mode<synchronous>, transform_indices = @transform_0, window_bounds = array<i64: 8, 8, 1>}, {pipeline_mode = #tpu.pipeline_mode<synchronous>, transform_indices = @transform_1, window_bounds = array<i64: 1, 256>}, {pipeline_mode = #tpu.pipeline_mode<synchronous>, transform_indices = @transform_2, window_bounds = array<i64: 64, 256>}, {pipeline_mode = #tpu.pipeline_mode<synchronous>, transform_indices = @transform_3, window_bounds = array<i64: 1, 256>}, {pipeline_mode = #tpu.pipeline_mode<synchronous>, transform_indices = @transform_4, window_bounds = array<i64: 1, 64>}, {pipeline_mode = #tpu.pipeline_mode<synchronous>, transform_indices = @transform_5, window_bounds = array<i64: 1, 1>}, {pipeline_mode = #tpu.pipeline_mode<synchronous>, transform_indices = @transform_6, window_bounds = array<i64: 8, 8>}]} {
    %c0 = arith.constant 0 : index
    %c0_0 = arith.constant 0 : index
    %0 = vector.load %arg3[%c0, %c0_0] : memref<64x256xbf16, #tpu.memory_space<vmem>>, vector<64x256xbf16>
    %c0_1 = arith.constant 0 : index
    %c0_2 = arith.constant 0 : index
    %1 = vector.load %arg2[%c0_1, %c0_2] : memref<1x256xf32, #tpu.memory_space<vmem>>, vector<1x256xf32>
    %c0_3 = arith.constant 0 : index
    %c0_4 = arith.constant 0 : index
    %2 = vector.load %arg4[%c0_3, %c0_4] : memref<1x256xf32, #tpu.memory_space<vmem>>, vector<1x256xf32>
    %cst = arith.constant 0.000000e+00 : f32
    %3 = vector.broadcast %cst : f32 to vector<8x64xf32>
    %cst_5 = arith.constant 0.000000e+00 : f32
    %4 = vector.broadcast %cst_5 : f32 to vector<8x64xf32>
    %c0_i32 = arith.constant 0 : i32
    %5 = arith.index_cast %c0_i32 : i32 to index
    %c0_6 = arith.constant 0 : index
    %c0_7 = arith.constant 0 : index
    %6 = vector.load %arg1[%5, %c0_6, %c0_7] : memref<8x8x1xf32, #tpu.memory_space<vmem>>, vector<1x8x1xf32>
    %7 = vector.shape_cast %6 : vector<1x8x1xf32> to vector<8x1xf32>
    %8 = vector.broadcast %7 : vector<8x1xf32> to vector<8x256xf32>
    %9 = vector.broadcast %1 : vector<1x256xf32> to vector<8x256xf32>
    %10 = arith.mulf %8, %9 : vector<8x256xf32>
    %11 = vector.broadcast %2 : vector<1x256xf32> to vector<8x256xf32>
    %12 = arith.addf %10, %11 : vector<8x256xf32>
    %13 = arith.truncf %3 : vector<8x64xf32> to vector<8x64xbf16>
    %cst_8 = arith.constant dense<0.000000e+00> : vector<8x256xf32>
    %14 = tpu.matmul %13, %0, %cst_8 {dimension_numbers = #tpu.dot_dimension_numbers<[1], [0], [0], [1], [0, 0, 1, 1], [], []>} : vector<8x64xbf16>, vector<64x256xbf16>, vector<8x256xf32> -> vector<8x256xf32>
    %15 = arith.addf %12, %14 : vector<8x256xf32>
    %16 = vector.extract_strided_slice %15 {offsets = [0, 0], sizes = [8, 64], strides = [1, 1]} : vector<8x256xf32> to vector<8x64xf32>
    %cst_9 = arith.constant 5.000000e-01 : f32
    %17 = vector.broadcast %cst_9 : f32 to vector<8x64xf32>
    %18 = arith.mulf %17, %16 : vector<8x64xf32>
    %19 = math.tanh %18 : vector<8x64xf32>
    %cst_10 = arith.constant 5.000000e-01 : f32
    %20 = vector.broadcast %cst_10 : f32 to vector<8x64xf32>
    %21 = arith.mulf %20, %19 : vector<8x64xf32>
    %cst_11 = arith.constant 5.000000e-01 : f32
    %22 = vector.broadcast %cst_11 : f32 to vector<8x64xf32>
    %23 = arith.addf %21, %22 : vector<8x64xf32>
    %24 = vector.extract_strided_slice %15 {offsets = [0, 64], sizes = [8, 64], strides = [1, 1]} : vector<8x256xf32> to vector<8x64xf32>
    %cst_12 = arith.constant 5.000000e-01 : f32
    %25 = vector.broadcast %cst_12 : f32 to vector<8x64xf32>
    %26 = arith.mulf %25, %24 : vector<8x64xf32>
    %27 = math.tanh %26 : vector<8x64xf32>
    %cst_13 = arith.constant 5.000000e-01 : f32
    %28 = vector.broadcast %cst_13 : f32 to vector<8x64xf32>
    %29 = arith.mulf %28, %27 : vector<8x64xf32>
    %cst_14 = arith.constant 5.000000e-01 : f32
    %30 = vector.broadcast %cst_14 : f32 to vector<8x64xf32>
    %31 = arith.addf %29, %30 : vector<8x64xf32>
    %32 = vector.extract_strided_slice %15 {offsets = [0, 128], sizes = [8, 64], strides = [1, 1]} : vector<8x256xf32> to vector<8x64xf32>
    %33 = math.tanh %32 : vector<8x64xf32>
    %34 = vector.extract_strided_slice %15 {offsets = [0, 192], sizes = [8, 64], strides = [1, 1]} : vector<8x256xf32> to vector<8x64xf32>
    %cst_15 = arith.constant 5.000000e-01 : f32
    %35 = vector.broadcast %cst_15 : f32 to vector<8x64xf32>
    %36 = arith.mulf %35, %34 : vector<8x64xf32>
    %37 = math.tanh %36 : vector<8x64xf32>
    %cst_16 = arith.constant 5.000000e-01 : f32
    %38 = vector.broadcast %cst_16 : f32 to vector<8x64xf32>
    %39 = arith.mulf %38, %37 : vector<8x64xf32>
    %cst_17 = arith.constant 5.000000e-01 : f32
    %40 = vector.broadcast %cst_17 : f32 to vector<8x64xf32>
    %41 = arith.addf %39, %40 : vector<8x64xf32>
    %42 = arith.mulf %31, %4 : vector<8x64xf32>
    %43 = arith.mulf %23, %33 : vector<8x64xf32>
    %44 = arith.addf %42, %43 : vector<8x64xf32>
    %45 = math.tanh %44 : vector<8x64xf32>
    %46 = arith.mulf %41, %45 : vector<8x64xf32>
    %47 = arith.index_cast %c0_i32 : i32 to index
    %c0_18 = arith.constant 0 : index
    %c0_19 = arith.constant 0 : index
    %48 = vector.load %arg8[%47, %c0_18, %c0_19] : memref<8x8x64xf32, #tpu.memory_space<vmem>>, vector<1x8x64xf32>
    %49 = vector.shape_cast %48 : vector<1x8x64xf32> to vector<8x64xf32>
    %50 = vector.shape_cast %46 : vector<8x64xf32> to vector<1x8x64xf32>
    tpu.vector_store %arg8[%47, %c0_18, %c0_19], %50 {strides = array<i32>} : memref<8x8x64xf32, #tpu.memory_space<vmem>>, vector<1x8x64xf32>,
    %c1_i32 = arith.constant 1 : i32
    %51 = arith.index_cast %c1_i32 : i32 to index
    %c0_20 = arith.constant 0 : index
    %c0_21 = arith.constant 0 : index
    %52 = vector.load %arg1[%51, %c0_20, %c0_21] : memref<8x8x1xf32, #tpu.memory_space<vmem>>, vector<1x8x1xf32>
    %53 = vector.shape_cast %52 : vector<1x8x1xf32> to vector<8x1xf32>
    %54 = vector.broadcast %53 : vector<8x1xf32> to vector<8x256xf32>
    %55 = vector.broadcast %1 : vector<1x256xf32> to vector<8x256xf32>
    %56 = arith.mulf %54, %55 : vector<8x256xf32>
    %57 = vector.broadcast %2 : vector<1x256xf32> to vector<8x256xf32>
    %58 = arith.addf %56, %57 : vector<8x256xf32>
    %59 = arith.truncf %46 : vector<8x64xf32> to vector<8x64xbf16>
    %cst_22 = arith.constant dense<0.000000e+00> : vector<8x256xf32>
    %60 = tpu.matmul %59, %0, %cst_22 {dimension_numbers = #tpu.dot_dimension_numbers<[1], [0], [0], [1], [0, 0, 1, 1], [], []>} : vector<8x64xbf16>, vector<64x256xbf16>, vector<8x256xf32> -> vector<8x256xf32>
    %61 = arith.addf %58, %60 : vector<8x256xf32>
    %62 = vector.extract_strided_slice %61 {offsets = [0, 0], sizes = [8, 64], strides = [1, 1]} : vector<8x256xf32> to vector<8x64xf32>
    %cst_23 = arith.constant 5.000000e-01 : f32
    %63 = vector.broadcast %cst_23 : f32 to vector<8x64xf32>
    %64 = arith.mulf %63, %62 : vector<8x64xf32>
    %65 = math.tanh %64 : vector<8x64xf32>
    %cst_24 = arith.constant 5.000000e-01 : f32
    %66 = vector.broadcast %cst_24 : f32 to vector<8x64xf32>
    %67 = arith.mulf %66, %65 : vector<8x64xf32>
    %cst_25 = arith.constant 5.000000e-01 : f32
    %68 = vector.broadcast %cst_25 : f32 to vector<8x64xf32>
    %69 = arith.addf %67, %68 : vector<8x64xf32>
    %70 = vector.extract_strided_slice %61 {offsets = [0, 64], sizes = [8, 64], strides = [1, 1]} : vector<8x256xf32> to vector<8x64xf32>
    %cst_26 = arith.constant 5.000000e-01 : f32
    %71 = vector.broadcast %cst_26 : f32 to vector<8x64xf32>
    %72 = arith.mulf %71, %70 : vector<8x64xf32>
    %73 = math.tanh %72 : vector<8x64xf32>
    %cst_27 = arith.constant 5.000000e-01 : f32
    %74 = vector.broadcast %cst_27 : f32 to vector<8x64xf32>
    %75 = arith.mulf %74, %73 : vector<8x64xf32>
    %cst_28 = arith.constant 5.000000e-01 : f32
    %76 = vector.broadcast %cst_28 : f32 to vector<8x64xf32>
    %77 = arith.addf %75, %76 : vector<8x64xf32>
    %78 = vector.extract_strided_slice %61 {offsets = [0, 128], sizes = [8, 64], strides = [1, 1]} : vector<8x256xf32> to vector<8x64xf32>
    %79 = math.tanh %78 : vector<8x64xf32>
    %80 = vector.extract_strided_slice %61 {offsets = [0, 192], sizes = [8, 64], strides = [1, 1]} : vector<8x256xf32> to vector<8x64xf32>
    %cst_29 = arith.constant 5.000000e-01 : f32
    %81 = vector.broadcast %cst_29 : f32 to vector<8x64xf32>
    %82 = arith.mulf %81, %80 : vector<8x64xf32>
    %83 = math.tanh %82 : vector<8x64xf32>
    %cst_30 = arith.constant 5.000000e-01 : f32
    %84 = vector.broadcast %cst_30 : f32 to vector<8x64xf32>
    %85 = arith.mulf %84, %83 : vector<8x64xf32>
    %cst_31 = arith.constant 5.000000e-01 : f32
    %86 = vector.broadcast %cst_31 : f32 to vector<8x64xf32>
    %87 = arith.addf %85, %86 : vector<8x64xf32>
    %88 = arith.mulf %77, %44 : vector<8x64xf32>
    %89 = arith.mulf %69, %79 : vector<8x64xf32>
    %90 = arith.addf %88, %89 : vector<8x64xf32>
    %91 = math.tanh %90 : vector<8x64xf32>
    %92 = arith.mulf %87, %91 : vector<8x64xf32>
    %93 = arith.index_cast %c1_i32 : i32 to index
    %c0_32 = arith.constant 0 : index
    %c0_33 = arith.constant 0 : index
    %94 = vector.load %arg8[%93, %c0_32, %c0_33] : memref<8x8x64xf32, #tpu.memory_space<vmem>>, vector<1x8x64xf32>
    %95 = vector.shape_cast %94 : vector<1x8x64xf32> to vector<8x64xf32>
    %96 = vector.shape_cast %92 : vector<8x64xf32> to vector<1x8x64xf32>
    tpu.vector_store %arg8[%93, %c0_32, %c0_33], %96 {strides = array<i32>} : memref<8x8x64xf32, #tpu.memory_space<vmem>>, vector<1x8x64xf32>,
    %c2_i32 = arith.constant 2 : i32
    %97 = arith.index_cast %c2_i32 : i32 to index
    %c0_34 = arith.constant 0 : index
    %c0_35 = arith.constant 0 : index
    %98 = vector.load %arg1[%97, %c0_34, %c0_35] : memref<8x8x1xf32, #tpu.memory_space<vmem>>, vector<1x8x1xf32>
    %99 = vector.shape_cast %98 : vector<1x8x1xf32> to vector<8x1xf32>
    %100 = vector.broadcast %99 : vector<8x1xf32> to vector<8x256xf32>
    %101 = vector.broadcast %1 : vector<1x256xf32> to vector<8x256xf32>
    %102 = arith.mulf %100, %101 : vector<8x256xf32>
    %103 = vector.broadcast %2 : vector<1x256xf32> to vector<8x256xf32>
    %104 = arith.addf %102, %103 : vector<8x256xf32>
    %105 = arith.truncf %92 : vector<8x64xf32> to vector<8x64xbf16>
    %cst_36 = arith.constant dense<0.000000e+00> : vector<8x256xf32>
    %106 = tpu.matmul %105, %0, %cst_36 {dimension_numbers = #tpu.dot_dimension_numbers<[1], [0], [0], [1], [0, 0, 1, 1], [], []>} : vector<8x64xbf16>, vector<64x256xbf16>, vector<8x256xf32> -> vector<8x256xf32>
    %107 = arith.addf %104, %106 : vector<8x256xf32>
    %108 = vector.extract_strided_slice %107 {offsets = [0, 0], sizes = [8, 64], strides = [1, 1]} : vector<8x256xf32> to vector<8x64xf32>
    %cst_37 = arith.constant 5.000000e-01 : f32
    %109 = vector.broadcast %cst_37 : f32 to vector<8x64xf32>
    %110 = arith.mulf %109, %108 : vector<8x64xf32>
    %111 = math.tanh %110 : vector<8x64xf32>
    %cst_38 = arith.constant 5.000000e-01 : f32
    %112 = vector.broadcast %cst_38 : f32 to vector<8x64xf32>
    %113 = arith.mulf %112, %111 : vector<8x64xf32>
    %cst_39 = arith.constant 5.000000e-01 : f32
    %114 = vector.broadcast %cst_39 : f32 to vector<8x64xf32>
    %115 = arith.addf %113, %114 : vector<8x64xf32>
    %116 = vector.extract_strided_slice %107 {offsets = [0, 64], sizes = [8, 64], strides = [1, 1]} : vector<8x256xf32> to vector<8x64xf32>
    %cst_40 = arith.constant 5.000000e-01 : f32
    %117 = vector.broadcast %cst_40 : f32 to vector<8x64xf32>
    %118 = arith.mulf %117, %116 : vector<8x64xf32>
    %119 = math.tanh %118 : vector<8x64xf32>
    %cst_41 = arith.constant 5.000000e-01 : f32
    %120 = vector.broadcast %cst_41 : f32 to vector<8x64xf32>
    %121 = arith.mulf %120, %119 : vector<8x64xf32>
    %cst_42 = arith.constant 5.000000e-01 : f32
    %122 = vector.broadcast %cst_42 : f32 to vector<8x64xf32>
    %123 = arith.addf %121, %122 : vector<8x64xf32>
    %124 = vector.extract_strided_slice %107 {offsets = [0, 128], sizes = [8, 64], strides = [1, 1]} : vector<8x256xf32> to vector<8x64xf32>
    %125 = math.tanh %124 : vector<8x64xf32>
    %126 = vector.extract_strided_slice %107 {offsets = [0, 192], sizes = [8, 64], strides = [1, 1]} : vector<8x256xf32> to vector<8x64xf32>
    %cst_43 = arith.constant 5.000000e-01 : f32
    %127 = vector.broadcast %cst_43 : f32 to vector<8x64xf32>
    %128 = arith.mulf %127, %126 : vector<8x64xf32>
    %129 = math.tanh %128 : vector<8x64xf32>
    %cst_44 = arith.constant 5.000000e-01 : f32
    %130 = vector.broadcast %cst_44 : f32 to vector<8x64xf32>
    %131 = arith.mulf %130, %129 : vector<8x64xf32>
    %cst_45 = arith.constant 5.000000e-01 : f32
    %132 = vector.broadcast %cst_45 : f32 to vector<8x64xf32>
    %133 = arith.addf %131, %132 : vector<8x64xf32>
    %134 = arith.mulf %123, %90 : vector<8x64xf32>
    %135 = arith.mulf %115, %125 : vector<8x64xf32>
    %136 = arith.addf %134, %135 : vector<8x64xf32>
    %137 = math.tanh %136 : vector<8x64xf32>
    %138 = arith.mulf %133, %137 : vector<8x64xf32>
    %139 = arith.index_cast %c2_i32 : i32 to index
    %c0_46 = arith.constant 0 : index
    %c0_47 = arith.constant 0 : index
    %140 = vector.load %arg8[%139, %c0_46, %c0_47] : memref<8x8x64xf32, #tpu.memory_space<vmem>>, vector<1x8x64xf32>
    %141 = vector.shape_cast %140 : vector<1x8x64xf32> to vector<8x64xf32>
    %142 = vector.shape_cast %138 : vector<8x64xf32> to vector<1x8x64xf32>
    tpu.vector_store %arg8[%139, %c0_46, %c0_47], %142 {strides = array<i32>} : memref<8x8x64xf32, #tpu.memory_space<vmem>>, vector<1x8x64xf32>,
    %c3_i32 = arith.constant 3 : i32
    %143 = arith.index_cast %c3_i32 : i32 to index
    %c0_48 = arith.constant 0 : index
    %c0_49 = arith.constant 0 : index
    %144 = vector.load %arg1[%143, %c0_48, %c0_49] : memref<8x8x1xf32, #tpu.memory_space<vmem>>, vector<1x8x1xf32>
    %145 = vector.shape_cast %144 : vector<1x8x1xf32> to vector<8x1xf32>
    %146 = vector.broadcast %145 : vector<8x1xf32> to vector<8x256xf32>
    %147 = vector.broadcast %1 : vector<1x256xf32> to vector<8x256xf32>
    %148 = arith.mulf %146, %147 : vector<8x256xf32>
    %149 = vector.broadcast %2 : vector<1x256xf32> to vector<8x256xf32>
    %150 = arith.addf %148, %149 : vector<8x256xf32>
    %151 = arith.truncf %138 : vector<8x64xf32> to vector<8x64xbf16>
    %cst_50 = arith.constant dense<0.000000e+00> : vector<8x256xf32>
    %152 = tpu.matmul %151, %0, %cst_50 {dimension_numbers = #tpu.dot_dimension_numbers<[1], [0], [0], [1], [0, 0, 1, 1], [], []>} : vector<8x64xbf16>, vector<64x256xbf16>, vector<8x256xf32> -> vector<8x256xf32>
    %153 = arith.addf %150, %152 : vector<8x256xf32>
    %154 = vector.extract_strided_slice %153 {offsets = [0, 0], sizes = [8, 64], strides = [1, 1]} : vector<8x256xf32> to vector<8x64xf32>
    %cst_51 = arith.constant 5.000000e-01 : f32
    %155 = vector.broadcast %cst_51 : f32 to vector<8x64xf32>
    %156 = arith.mulf %155, %154 : vector<8x64xf32>
    %157 = math.tanh %156 : vector<8x64xf32>
    %cst_52 = arith.constant 5.000000e-01 : f32
    %158 = vector.broadcast %cst_52 : f32 to vector<8x64xf32>
    %159 = arith.mulf %158, %157 : vector<8x64xf32>
    %cst_53 = arith.constant 5.000000e-01 : f32
    %160 = vector.broadcast %cst_53 : f32 to vector<8x64xf32>
    %161 = arith.addf %159, %160 : vector<8x64xf32>
    %162 = vector.extract_strided_slice %153 {offsets = [0, 64], sizes = [8, 64], strides = [1, 1]} : vector<8x256xf32> to vector<8x64xf32>
    %cst_54 = arith.constant 5.000000e-01 : f32
    %163 = vector.broadcast %cst_54 : f32 to vector<8x64xf32>
    %164 = arith.mulf %163, %162 : vector<8x64xf32>
    %165 = math.tanh %164 : vector<8x64xf32>
    %cst_55 = arith.constant 5.000000e-01 : f32
    %166 = vector.broadcast %cst_55 : f32 to vector<8x64xf32>
    %167 = arith.mulf %166, %165 : vector<8x64xf32>
    %cst_56 = arith.constant 5.000000e-01 : f32
    %168 = vector.broadcast %cst_56 : f32 to vector<8x64xf32>
    %169 = arith.addf %167, %168 : vector<8x64xf32>
    %170 = vector.extract_strided_slice %153 {offsets = [0, 128], sizes = [8, 64], strides = [1, 1]} : vector<8x256xf32> to vector<8x64xf32>
    %171 = math.tanh %170 : vector<8x64xf32>
    %172 = vector.extract_strided_slice %153 {offsets = [0, 192], sizes = [8, 64], strides = [1, 1]} : vector<8x256xf32> to vector<8x64xf32>
    %cst_57 = arith.constant 5.000000e-01 : f32
    %173 = vector.broadcast %cst_57 : f32 to vector<8x64xf32>
    %174 = arith.mulf %173, %172 : vector<8x64xf32>
    %175 = math.tanh %174 : vector<8x64xf32>
    %cst_58 = arith.constant 5.000000e-01 : f32
    %176 = vector.broadcast %cst_58 : f32 to vector<8x64xf32>
    %177 = arith.mulf %176, %175 : vector<8x64xf32>
    %cst_59 = arith.constant 5.000000e-01 : f32
    %178 = vector.broadcast %cst_59 : f32 to vector<8x64xf32>
    %179 = arith.addf %177, %178 : vector<8x64xf32>
    %180 = arith.mulf %169, %136 : vector<8x64xf32>
    %181 = arith.mulf %161, %171 : vector<8x64xf32>
    %182 = arith.addf %180, %181 : vector<8x64xf32>
    %183 = math.tanh %182 : vector<8x64xf32>
    %184 = arith.mulf %179, %183 : vector<8x64xf32>
    %185 = arith.index_cast %c3_i32 : i32 to index
    %c0_60 = arith.constant 0 : index
    %c0_61 = arith.constant 0 : index
    %186 = vector.load %arg8[%185, %c0_60, %c0_61] : memref<8x8x64xf32, #tpu.memory_space<vmem>>, vector<1x8x64xf32>
    %187 = vector.shape_cast %186 : vector<1x8x64xf32> to vector<8x64xf32>
    %188 = vector.shape_cast %184 : vector<8x64xf32> to vector<1x8x64xf32>
    tpu.vector_store %arg8[%185, %c0_60, %c0_61], %188 {strides = array<i32>} : memref<8x8x64xf32, #tpu.memory_space<vmem>>, vector<1x8x64xf32>,
    %c4_i32 = arith.constant 4 : i32
    %189 = arith.index_cast %c4_i32 : i32 to index
    %c0_62 = arith.constant 0 : index
    %c0_63 = arith.constant 0 : index
    %190 = vector.load %arg1[%189, %c0_62, %c0_63] : memref<8x8x1xf32, #tpu.memory_space<vmem>>, vector<1x8x1xf32>
    %191 = vector.shape_cast %190 : vector<1x8x1xf32> to vector<8x1xf32>
    %192 = vector.broadcast %191 : vector<8x1xf32> to vector<8x256xf32>
    %193 = vector.broadcast %1 : vector<1x256xf32> to vector<8x256xf32>
    %194 = arith.mulf %192, %193 : vector<8x256xf32>
    %195 = vector.broadcast %2 : vector<1x256xf32> to vector<8x256xf32>
    %196 = arith.addf %194, %195 : vector<8x256xf32>
    %197 = arith.truncf %184 : vector<8x64xf32> to vector<8x64xbf16>
    %cst_64 = arith.constant dense<0.000000e+00> : vector<8x256xf32>
    %198 = tpu.matmul %197, %0, %cst_64 {dimension_numbers = #tpu.dot_dimension_numbers<[1], [0], [0], [1], [0, 0, 1, 1], [], []>} : vector<8x64xbf16>, vector<64x256xbf16>, vector<8x256xf32> -> vector<8x256xf32>
    %199 = arith.addf %196, %198 : vector<8x256xf32>
    %200 = vector.extract_strided_slice %199 {offsets = [0, 0], sizes = [8, 64], strides = [1, 1]} : vector<8x256xf32> to vector<8x64xf32>
    %cst_65 = arith.constant 5.000000e-01 : f32
    %201 = vector.broadcast %cst_65 : f32 to vector<8x64xf32>
    %202 = arith.mulf %201, %200 : vector<8x64xf32>
    %203 = math.tanh %202 : vector<8x64xf32>
    %cst_66 = arith.constant 5.000000e-01 : f32
    %204 = vector.broadcast %cst_66 : f32 to vector<8x64xf32>
    %205 = arith.mulf %204, %203 : vector<8x64xf32>
    %cst_67 = arith.constant 5.000000e-01 : f32
    %206 = vector.broadcast %cst_67 : f32 to vector<8x64xf32>
    %207 = arith.addf %205, %206 : vector<8x64xf32>
    %208 = vector.extract_strided_slice %199 {offsets = [0, 64], sizes = [8, 64], strides = [1, 1]} : vector<8x256xf32> to vector<8x64xf32>
    %cst_68 = arith.constant 5.000000e-01 : f32
    %209 = vector.broadcast %cst_68 : f32 to vector<8x64xf32>
    %210 = arith.mulf %209, %208 : vector<8x64xf32>
    %211 = math.tanh %210 : vector<8x64xf32>
    %cst_69 = arith.constant 5.000000e-01 : f32
    %212 = vector.broadcast %cst_69 : f32 to vector<8x64xf32>
    %213 = arith.mulf %212, %211 : vector<8x64xf32>
    %cst_70 = arith.constant 5.000000e-01 : f32
    %214 = vector.broadcast %cst_70 : f32 to vector<8x64xf32>
    %215 = arith.addf %213, %214 : vector<8x64xf32>
    %216 = vector.extract_strided_slice %199 {offsets = [0, 128], sizes = [8, 64], strides = [1, 1]} : vector<8x256xf32> to vector<8x64xf32>
    %217 = math.tanh %216 : vector<8x64xf32>
    %218 = vector.extract_strided_slice %199 {offsets = [0, 192], sizes = [8, 64], strides = [1, 1]} : vector<8x256xf32> to vector<8x64xf32>
    %cst_71 = arith.constant 5.000000e-01 : f32
    %219 = vector.broadcast %cst_71 : f32 to vector<8x64xf32>
    %220 = arith.mulf %219, %218 : vector<8x64xf32>
    %221 = math.tanh %220 : vector<8x64xf32>
    %cst_72 = arith.constant 5.000000e-01 : f32
    %222 = vector.broadcast %cst_72 : f32 to vector<8x64xf32>
    %223 = arith.mulf %222, %221 : vector<8x64xf32>
    %cst_73 = arith.constant 5.000000e-01 : f32
    %224 = vector.broadcast %cst_73 : f32 to vector<8x64xf32>
    %225 = arith.addf %223, %224 : vector<8x64xf32>
    %226 = arith.mulf %215, %182 : vector<8x64xf32>
    %227 = arith.mulf %207, %217 : vector<8x64xf32>
    %228 = arith.addf %226, %227 : vector<8x64xf32>
    %229 = math.tanh %228 : vector<8x64xf32>
    %230 = arith.mulf %225, %229 : vector<8x64xf32>
    %231 = arith.index_cast %c4_i32 : i32 to index
    %c0_74 = arith.constant 0 : index
    %c0_75 = arith.constant 0 : index
    %232 = vector.load %arg8[%231, %c0_74, %c0_75] : memref<8x8x64xf32, #tpu.memory_space<vmem>>, vector<1x8x64xf32>
    %233 = vector.shape_cast %232 : vector<1x8x64xf32> to vector<8x64xf32>
    %234 = vector.shape_cast %230 : vector<8x64xf32> to vector<1x8x64xf32>
    tpu.vector_store %arg8[%231, %c0_74, %c0_75], %234 {strides = array<i32>} : memref<8x8x64xf32, #tpu.memory_space<vmem>>, vector<1x8x64xf32>,
    %c5_i32 = arith.constant 5 : i32
    %235 = arith.index_cast %c5_i32 : i32 to index
    %c0_76 = arith.constant 0 : index
    %c0_77 = arith.constant 0 : index
    %236 = vector.load %arg1[%235, %c0_76, %c0_77] : memref<8x8x1xf32, #tpu.memory_space<vmem>>, vector<1x8x1xf32>
    %237 = vector.shape_cast %236 : vector<1x8x1xf32> to vector<8x1xf32>
    %238 = vector.broadcast %237 : vector<8x1xf32> to vector<8x256xf32>
    %239 = vector.broadcast %1 : vector<1x256xf32> to vector<8x256xf32>
    %240 = arith.mulf %238, %239 : vector<8x256xf32>
    %241 = vector.broadcast %2 : vector<1x256xf32> to vector<8x256xf32>
    %242 = arith.addf %240, %241 : vector<8x256xf32>
    %243 = arith.truncf %230 : vector<8x64xf32> to vector<8x64xbf16>
    %cst_78 = arith.constant dense<0.000000e+00> : vector<8x256xf32>
    %244 = tpu.matmul %243, %0, %cst_78 {dimension_numbers = #tpu.dot_dimension_numbers<[1], [0], [0], [1], [0, 0, 1, 1], [], []>} : vector<8x64xbf16>, vector<64x256xbf16>, vector<8x256xf32> -> vector<8x256xf32>
    %245 = arith.addf %242, %244 : vector<8x256xf32>
    %246 = vector.extract_strided_slice %245 {offsets = [0, 0], sizes = [8, 64], strides = [1, 1]} : vector<8x256xf32> to vector<8x64xf32>
    %cst_79 = arith.constant 5.000000e-01 : f32
    %247 = vector.broadcast %cst_79 : f32 to vector<8x64xf32>
    %248 = arith.mulf %247, %246 : vector<8x64xf32>
    %249 = math.tanh %248 : vector<8x64xf32>
    %cst_80 = arith.constant 5.000000e-01 : f32
    %250 = vector.broadcast %cst_80 : f32 to vector<8x64xf32>
    %251 = arith.mulf %250, %249 : vector<8x64xf32>
    %cst_81 = arith.constant 5.000000e-01 : f32
    %252 = vector.broadcast %cst_81 : f32 to vector<8x64xf32>
    %253 = arith.addf %251, %252 : vector<8x64xf32>
    %254 = vector.extract_strided_slice %245 {offsets = [0, 64], sizes = [8, 64], strides = [1, 1]} : vector<8x256xf32> to vector<8x64xf32>
    %cst_82 = arith.constant 5.000000e-01 : f32
    %255 = vector.broadcast %cst_82 : f32 to vector<8x64xf32>
    %256 = arith.mulf %255, %254 : vector<8x64xf32>
    %257 = math.tanh %256 : vector<8x64xf32>
    %cst_83 = arith.constant 5.000000e-01 : f32
    %258 = vector.broadcast %cst_83 : f32 to vector<8x64xf32>
    %259 = arith.mulf %258, %257 : vector<8x64xf32>
    %cst_84 = arith.constant 5.000000e-01 : f32
    %260 = vector.broadcast %cst_84 : f32 to vector<8x64xf32>
    %261 = arith.addf %259, %260 : vector<8x64xf32>
    %262 = vector.extract_strided_slice %245 {offsets = [0, 128], sizes = [8, 64], strides = [1, 1]} : vector<8x256xf32> to vector<8x64xf32>
    %263 = math.tanh %262 : vector<8x64xf32>
    %264 = vector.extract_strided_slice %245 {offsets = [0, 192], sizes = [8, 64], strides = [1, 1]} : vector<8x256xf32> to vector<8x64xf32>
    %cst_85 = arith.constant 5.000000e-01 : f32
    %265 = vector.broadcast %cst_85 : f32 to vector<8x64xf32>
    %266 = arith.mulf %265, %264 : vector<8x64xf32>
    %267 = math.tanh %266 : vector<8x64xf32>
    %cst_86 = arith.constant 5.000000e-01 : f32
    %268 = vector.broadcast %cst_86 : f32 to vector<8x64xf32>
    %269 = arith.mulf %268, %267 : vector<8x64xf32>
    %cst_87 = arith.constant 5.000000e-01 : f32
    %270 = vector.broadcast %cst_87 : f32 to vector<8x64xf32>
    %271 = arith.addf %269, %270 : vector<8x64xf32>
    %272 = arith.mulf %261, %228 : vector<8x64xf32>
    %273 = arith.mulf %253, %263 : vector<8x64xf32>
    %274 = arith.addf %272, %273 : vector<8x64xf32>
    %275 = math.tanh %274 : vector<8x64xf32>
    %276 = arith.mulf %271, %275 : vector<8x64xf32>
    %277 = arith.index_cast %c5_i32 : i32 to index
    %c0_88 = arith.constant 0 : index
    %c0_89 = arith.constant 0 : index
    %278 = vector.load %arg8[%277, %c0_88, %c0_89] : memref<8x8x64xf32, #tpu.memory_space<vmem>>, vector<1x8x64xf32>
    %279 = vector.shape_cast %278 : vector<1x8x64xf32> to vector<8x64xf32>
    %280 = vector.shape_cast %276 : vector<8x64xf32> to vector<1x8x64xf32>
    tpu.vector_store %arg8[%277, %c0_88, %c0_89], %280 {strides = array<i32>} : memref<8x8x64xf32, #tpu.memory_space<vmem>>, vector<1x8x64xf32>,
    %c6_i32 = arith.constant 6 : i32
    %281 = arith.index_cast %c6_i32 : i32 to index
    %c0_90 = arith.constant 0 : index
    %c0_91 = arith.constant 0 : index
    %282 = vector.load %arg1[%281, %c0_90, %c0_91] : memref<8x8x1xf32, #tpu.memory_space<vmem>>, vector<1x8x1xf32>
    %283 = vector.shape_cast %282 : vector<1x8x1xf32> to vector<8x1xf32>
    %284 = vector.broadcast %283 : vector<8x1xf32> to vector<8x256xf32>
    %285 = vector.broadcast %1 : vector<1x256xf32> to vector<8x256xf32>
    %286 = arith.mulf %284, %285 : vector<8x256xf32>
    %287 = vector.broadcast %2 : vector<1x256xf32> to vector<8x256xf32>
    %288 = arith.addf %286, %287 : vector<8x256xf32>
    %289 = arith.truncf %276 : vector<8x64xf32> to vector<8x64xbf16>
    %cst_92 = arith.constant dense<0.000000e+00> : vector<8x256xf32>
    %290 = tpu.matmul %289, %0, %cst_92 {dimension_numbers = #tpu.dot_dimension_numbers<[1], [0], [0], [1], [0, 0, 1, 1], [], []>} : vector<8x64xbf16>, vector<64x256xbf16>, vector<8x256xf32> -> vector<8x256xf32>
    %291 = arith.addf %288, %290 : vector<8x256xf32>
    %292 = vector.extract_strided_slice %291 {offsets = [0, 0], sizes = [8, 64], strides = [1, 1]} : vector<8x256xf32> to vector<8x64xf32>
    %cst_93 = arith.constant 5.000000e-01 : f32
    %293 = vector.broadcast %cst_93 : f32 to vector<8x64xf32>
    %294 = arith.mulf %293, %292 : vector<8x64xf32>
    %295 = math.tanh %294 : vector<8x64xf32>
    %cst_94 = arith.constant 5.000000e-01 : f32
    %296 = vector.broadcast %cst_94 : f32 to vector<8x64xf32>
    %297 = arith.mulf %296, %295 : vector<8x64xf32>
    %cst_95 = arith.constant 5.000000e-01 : f32
    %298 = vector.broadcast %cst_95 : f32 to vector<8x64xf32>
    %299 = arith.addf %297, %298 : vector<8x64xf32>
    %300 = vector.extract_strided_slice %291 {offsets = [0, 64], sizes = [8, 64], strides = [1, 1]} : vector<8x256xf32> to vector<8x64xf32>
    %cst_96 = arith.constant 5.000000e-01 : f32
    %301 = vector.broadcast %cst_96 : f32 to vector<8x64xf32>
    %302 = arith.mulf %301, %300 : vector<8x64xf32>
    %303 = math.tanh %302 : vector<8x64xf32>
    %cst_97 = arith.constant 5.000000e-01 : f32
    %304 = vector.broadcast %cst_97 : f32 to vector<8x64xf32>
    %305 = arith.mulf %304, %303 : vector<8x64xf32>
    %cst_98 = arith.constant 5.000000e-01 : f32
    %306 = vector.broadcast %cst_98 : f32 to vector<8x64xf32>
    %307 = arith.addf %305, %306 : vector<8x64xf32>
    %308 = vector.extract_strided_slice %291 {offsets = [0, 128], sizes = [8, 64], strides = [1, 1]} : vector<8x256xf32> to vector<8x64xf32>
    %309 = math.tanh %308 : vector<8x64xf32>
    %310 = vector.extract_strided_slice %291 {offsets = [0, 192], sizes = [8, 64], strides = [1, 1]} : vector<8x256xf32> to vector<8x64xf32>
    %cst_99 = arith.constant 5.000000e-01 : f32
    %311 = vector.broadcast %cst_99 : f32 to vector<8x64xf32>
    %312 = arith.mulf %311, %310 : vector<8x64xf32>
    %313 = math.tanh %312 : vector<8x64xf32>
    %cst_100 = arith.constant 5.000000e-01 : f32
    %314 = vector.broadcast %cst_100 : f32 to vector<8x64xf32>
    %315 = arith.mulf %314, %313 : vector<8x64xf32>
    %cst_101 = arith.constant 5.000000e-01 : f32
    %316 = vector.broadcast %cst_101 : f32 to vector<8x64xf32>
    %317 = arith.addf %315, %316 : vector<8x64xf32>
    %318 = arith.mulf %307, %274 : vector<8x64xf32>
    %319 = arith.mulf %299, %309 : vector<8x64xf32>
    %320 = arith.addf %318, %319 : vector<8x64xf32>
    %321 = math.tanh %320 : vector<8x64xf32>
    %322 = arith.mulf %317, %321 : vector<8x64xf32>
    %323 = arith.index_cast %c6_i32 : i32 to index
    %c0_102 = arith.constant 0 : index
    %c0_103 = arith.constant 0 : index
    %324 = vector.load %arg8[%323, %c0_102, %c0_103] : memref<8x8x64xf32, #tpu.memory_space<vmem>>, vector<1x8x64xf32>
    %325 = vector.shape_cast %324 : vector<1x8x64xf32> to vector<8x64xf32>
    %326 = vector.shape_cast %322 : vector<8x64xf32> to vector<1x8x64xf32>
    tpu.vector_store %arg8[%323, %c0_102, %c0_103], %326 {strides = array<i32>} : memref<8x8x64xf32, #tpu.memory_space<vmem>>, vector<1x8x64xf32>,
    %c7_i32 = arith.constant 7 : i32
    %327 = arith.index_cast %c7_i32 : i32 to index
    %c0_104 = arith.constant 0 : index
    %c0_105 = arith.constant 0 : index
    %328 = vector.load %arg1[%327, %c0_104, %c0_105] : memref<8x8x1xf32, #tpu.memory_space<vmem>>, vector<1x8x1xf32>
    %329 = vector.shape_cast %328 : vector<1x8x1xf32> to vector<8x1xf32>
    %330 = vector.broadcast %329 : vector<8x1xf32> to vector<8x256xf32>
    %331 = vector.broadcast %1 : vector<1x256xf32> to vector<8x256xf32>
    %332 = arith.mulf %330, %331 : vector<8x256xf32>
    %333 = vector.broadcast %2 : vector<1x256xf32> to vector<8x256xf32>
    %334 = arith.addf %332, %333 : vector<8x256xf32>
    %335 = arith.truncf %322 : vector<8x64xf32> to vector<8x64xbf16>
    %cst_106 = arith.constant dense<0.000000e+00> : vector<8x256xf32>
    %336 = tpu.matmul %335, %0, %cst_106 {dimension_numbers = #tpu.dot_dimension_numbers<[1], [0], [0], [1], [0, 0, 1, 1], [], []>} : vector<8x64xbf16>, vector<64x256xbf16>, vector<8x256xf32> -> vector<8x256xf32>
    %337 = arith.addf %334, %336 : vector<8x256xf32>
    %338 = vector.extract_strided_slice %337 {offsets = [0, 0], sizes = [8, 64], strides = [1, 1]} : vector<8x256xf32> to vector<8x64xf32>
    %cst_107 = arith.constant 5.000000e-01 : f32
    %339 = vector.broadcast %cst_107 : f32 to vector<8x64xf32>
    %340 = arith.mulf %339, %338 : vector<8x64xf32>
    %341 = math.tanh %340 : vector<8x64xf32>
    %cst_108 = arith.constant 5.000000e-01 : f32
    %342 = vector.broadcast %cst_108 : f32 to vector<8x64xf32>
    %343 = arith.mulf %342, %341 : vector<8x64xf32>
    %cst_109 = arith.constant 5.000000e-01 : f32
    %344 = vector.broadcast %cst_109 : f32 to vector<8x64xf32>
    %345 = arith.addf %343, %344 : vector<8x64xf32>
    %346 = vector.extract_strided_slice %337 {offsets = [0, 64], sizes = [8, 64], strides = [1, 1]} : vector<8x256xf32> to vector<8x64xf32>
    %cst_110 = arith.constant 5.000000e-01 : f32
    %347 = vector.broadcast %cst_110 : f32 to vector<8x64xf32>
    %348 = arith.mulf %347, %346 : vector<8x64xf32>
    %349 = math.tanh %348 : vector<8x64xf32>
    %cst_111 = arith.constant 5.000000e-01 : f32
    %350 = vector.broadcast %cst_111 : f32 to vector<8x64xf32>
    %351 = arith.mulf %350, %349 : vector<8x64xf32>
    %cst_112 = arith.constant 5.000000e-01 : f32
    %352 = vector.broadcast %cst_112 : f32 to vector<8x64xf32>
    %353 = arith.addf %351, %352 : vector<8x64xf32>
    %354 = vector.extract_strided_slice %337 {offsets = [0, 128], sizes = [8, 64], strides = [1, 1]} : vector<8x256xf32> to vector<8x64xf32>
    %355 = math.tanh %354 : vector<8x64xf32>
    %356 = vector.extract_strided_slice %337 {offsets = [0, 192], sizes = [8, 64], strides = [1, 1]} : vector<8x256xf32> to vector<8x64xf32>
    %cst_113 = arith.constant 5.000000e-01 : f32
    %357 = vector.broadcast %cst_113 : f32 to vector<8x64xf32>
    %358 = arith.mulf %357, %356 : vector<8x64xf32>
    %359 = math.tanh %358 : vector<8x64xf32>
    %cst_114 = arith.constant 5.000000e-01 : f32
    %360 = vector.broadcast %cst_114 : f32 to vector<8x64xf32>
    %361 = arith.mulf %360, %359 : vector<8x64xf32>
    %cst_115 = arith.constant 5.000000e-01 : f32
    %362 = vector.broadcast %cst_115 : f32 to vector<8x64xf32>
    %363 = arith.addf %361, %362 : vector<8x64xf32>
    %364 = arith.mulf %353, %320 : vector<8x64xf32>
    %365 = arith.mulf %345, %355 : vector<8x64xf32>
    %366 = arith.addf %364, %365 : vector<8x64xf32>
    %367 = math.tanh %366 : vector<8x64xf32>
    %368 = arith.mulf %363, %367 : vector<8x64xf32>
    %369 = arith.index_cast %c7_i32 : i32 to index
    %c0_116 = arith.constant 0 : index
    %c0_117 = arith.constant 0 : index
    %370 = vector.load %arg8[%369, %c0_116, %c0_117] : memref<8x8x64xf32, #tpu.memory_space<vmem>>, vector<1x8x64xf32>
    %371 = vector.shape_cast %370 : vector<1x8x64xf32> to vector<8x64xf32>
    %372 = vector.shape_cast %368 : vector<8x64xf32> to vector<1x8x64xf32>
    tpu.vector_store %arg8[%369, %c0_116, %c0_117], %372 {strides = array<i32>} : memref<8x8x64xf32, #tpu.memory_space<vmem>>, vector<1x8x64xf32>,
    %c8_i32 = arith.constant 8 : i32
    %c0_118 = arith.constant 0 : index
    %c0_119 = arith.constant 0 : index
    %c0_120 = arith.constant 0 : index
    %373 = vector.load %arg8[%c0_118, %c0_119, %c0_120] : memref<8x8x64xf32, #tpu.memory_space<vmem>>, vector<8x8x64xf32>
    %c0_121 = arith.constant 0 : index
    %c0_122 = arith.constant 0 : index
    %374 = vector.load %arg5[%c0_121, %c0_122] : memref<1x64xf32, #tpu.memory_space<vmem>>, vector<1x64xf32>
    %375 = vector.shape_cast %374 : vector<1x64xf32> to vector<1x1x64xf32>
    %376 = vector.broadcast %375 : vector<1x1x64xf32> to vector<8x8x64xf32>
    %377 = arith.mulf %373, %376 : vector<8x8x64xf32>
    %cst_123 = arith.constant dense<0.000000e+00> : vector<8x8xf32>
    %378 = vector.multi_reduction <add>, %377, %cst_123 [2] : vector<8x8x64xf32> to vector<8x8xf32>
    %c0_124 = arith.constant 0 : index
    %c0_125 = arith.constant 0 : index
    %379 = vector.load %arg6[%c0_124, %c0_125] : memref<1x1xf32, #tpu.memory_space<vmem>>, vector<1x1xf32>
    %380 = vector.broadcast %379 : vector<1x1xf32> to vector<8x8xf32>
    %381 = arith.addf %378, %380 : vector<8x8xf32>
    %c0_126 = arith.constant 0 : index
    %c0_127 = arith.constant 0 : index
    %382 = vector.load %arg7[%c0_126, %c0_127] : memref<8x8xf32, #tpu.memory_space<vmem>>, vector<8x8xf32>
    tpu.vector_store %arg7[%c0_126, %c0_127], %381 {strides = array<i32>} : memref<8x8xf32, #tpu.memory_space<vmem>>, vector<8x8xf32>,
    return
  }
  func.func @transform_0(%arg0: i32) -> (i32, i32, i32) {
    %c0_i32 = arith.constant 0 : i32
    %c0_i32_0 = arith.constant 0 : i32
    %c0_i32_1 = arith.constant 0 : i32
    %c0_i32_2 = arith.constant 0 : i32
    return %c0_i32, %c0_i32_0, %c0_i32_1 : i32, i32, i32
  }
  func.func @transform_1(%arg0: i32) -> (i32, i32) {
    %c0_i32 = arith.constant 0 : i32
    %c0_i32_0 = arith.constant 0 : i32
    %c0_i32_1 = arith.constant 0 : i32
    return %c0_i32, %c0_i32_0 : i32, i32
  }
  func.func @transform_2(%arg0: i32) -> (i32, i32) {
    %c0_i32 = arith.constant 0 : i32
    %c0_i32_0 = arith.constant 0 : i32
    %c0_i32_1 = arith.constant 0 : i32
    return %c0_i32, %c0_i32_0 : i32, i32
  }
  func.func @transform_3(%arg0: i32) -> (i32, i32) {
    %c0_i32 = arith.constant 0 : i32
    %c0_i32_0 = arith.constant 0 : i32
    %c0_i32_1 = arith.constant 0 : i32
    return %c0_i32, %c0_i32_0 : i32, i32
  }
  func.func @transform_4(%arg0: i32) -> (i32, i32) {
    %c0_i32 = arith.constant 0 : i32
    %c0_i32_0 = arith.constant 0 : i32
    %c0_i32_1 = arith.constant 0 : i32
    return %c0_i32, %c0_i32_0 : i32, i32
  }
  func.func @transform_5(%arg0: i32) -> (i32, i32) {
    %c0_i32 = arith.constant 0 : i32
    %c0_i32_0 = arith.constant 0 : i32
    %c0_i32_1 = arith.constant 0 : i32
    return %c0_i32, %c0_i32_0 : i32, i32
  }
  func.func @transform_6(%arg0: i32) -> (i32, i32) {
    %c0_i32 = arith.constant 0 : i32
    %c0_i32_0 = arith.constant 0 : i32
    %c0_i32_1 = arith.constant 0 : i32
    return %c0_i32, %c0_i32_0 : i32, i32
  }
}

</mosaic_0001>

<bundles_post_ra>
// kernel: tpu_custom_call.1
= control target key start
LH: loop header
LB: loop body
LE: loop exit
PB: predicated region body
PF: predicated region fallthrough
CT: control target
= control target key end

     0   :  { %s1375_s0 = inlined_call_operand.vmem [shape: f32[8,8,1], index: 0, kind: input, shape index: {}]   ;;  %s1376_s1 = inlined_call_operand.vmem [shape: f32[1,256], index: 1, kind: input, shape index: {}]   ;;  %s1377_s2 = inlined_call_operand.vmem [shape: bf16[64,256], index: 2, kind: input, shape index: {}]   ;;  %s1378_s3 = inlined_call_operand.vmem [shape: f32[1,256], index: 3, kind: input, shape index: {}]   ;;  %s1379_s4 = inlined_call_operand.vmem [shape: f32[1,64], index: 4, kind: input, shape index: {}]   ;;  %s1380_s5 = inlined_call_operand.<no memory space> [shape: f32[1,1], index: 5, kind: input, shape index: {}]   ;;  %s1381_s6 = inlined_call_operand.hbm [shape: f32[8,8], index: 6, kind: output, shape index: {}]  }
   0x1   :  { %v11_v0 = vstv %s1380_s5 }
   0x2   :  { %12 = vst [vmem:[#allocation3] sm:$0x1] %v11_v0 }
   0x3   :  { %v1085_v1 = vld [vmem:[%s1377_s2 + $0x4] ss:$8 sps:$4 sm:$0xff]   ;;  %v1090_v2 = vld [vmem:[%s1377_s2] ss:$8 sps:$4 sm:$0xff]   ;;  %v1041_v3 = vmov 0  }
   0x4   :  { %145 = vmatprep.mubr.bf16.mxu0 %v1041_v3  ;;  %939 = vset.pattern.permute.xlu0 %v1041_v3  ;;  %v1098_v4 = vld [vmem:[%s1377_s2 + $0x14] ss:$8 sps:$4 sm:$0xff]   ;;  %v1105_v5 = vld [vmem:[%s1377_s2 + $0x10] ss:$8 sps:$4 sm:$0xff]   ;;  %v1112_v6 = vld [vmem:[%s1377_s2 + $0x24] ss:$8 sps:$4 sm:$0xff]  }
   0x5   :  { %113 = vmatprep.subr.bf16.mxu0 %v1085_v1  ;;  %197 = vmatprep.subr.bf16.mxu1 %v1085_v1  ;;  %v37_v7 = vld [vmem:[%s1375_s0] sm:$0xff] }
   0x6   :  { %114 = vmatpush1.bf16.msra.mxu0 %v1090_v2  ;;  %198 = vmatpush1.bf16.msra.mxu1 %v1090_v2 }
   0x7   :  { %115 = vmatprep.subr.bf16.mxu0 %v1098_v4  ;;  %199 = vmatprep.subr.bf16.mxu1 %v1098_v4 }
   0x8   :  { %229 = vmatprep.mubr.bf16.mxu1 %v1041_v3  ;;  %940 = vset.pattern.permute.xlu1 %v1041_v3 }
   0x9   :  { %40 = vperm.xlu0 %939, %v37_v7  }
   0xa   :  { %13 = vsyncpa [#allocation5], 0  ;;  %116 = vmatpush1.bf16.msra.mxu0 %v1105_v5  ;;  %v1124_v8 = vld [vmem:[%s1377_s2 + $0x20] ss:$8 sps:$4 sm:$0xff]   ;;  %200 = vmatpush1.bf16.msra.mxu1 %v1105_v5  ;;  %v1131_v9 = vld [vmem:[%s1377_s2 + $0x34] ss:$8 sps:$4 sm:$0xff]   ;;  %v44_v11 = vlaneseq }
   0xb   :  { %117 = vmatprep.subr.bf16.mxu0 %v1112_v6  ;;  %201 = vmatprep.subr.bf16.mxu1 %v1112_v6  ;;  %v1138_v10 = vld [vmem:[%s1377_s2 + $0x30] ss:$8 sps:$4 sm:$0xff]   ;;  %v35_v14 = vld [vmem:[%s1376_s1] sm:$0x3]  ;;  %s1042_s1 = smov 64   ;;  %v920_v48 = vld [vmem:[%s1375_s0 + $0x8] sm:$0xff] }
   0xc   :  { %v1158_v12 = vshrl.u32 %v44_v11, 7  ;;  %v36_v18 = vld [vmem:[%s1378_s3] sm:$0x3]  ;;  %vm109_vm0 = vcmask 523264   ;;  %vm881_vm1 = vcmask 1041409   ;;  %vm883_vm2 = vcmask 1042434  }
   0xd   :  { %vm885_vm3 = vcmask 1043459   ;;  %vm887_vm4 = vcmask 1044484   ;;  %vm889_vm5 = vcmask 1045509   ;;  %vm891_vm6 = vcmask 1046534  }
   0xe   :  { %118 = vmatpush1.bf16.msra.mxu0 %v1124_v8  ;;  %202 = vmatpush1.bf16.msra.mxu1 %v1124_v8  ;;  %v46_v13 = vsub.s32 0, %v1158_v12  ;;  %v50_v15 = vsub.s32 1, %v1158_v12  ;;  %vm893_vm7 = vcmask 1047559   ;;  %vm896_vm8 = vcmask 64512  }
   0xf   :  { %119 = vmatprep.subr.bf16.mxu0 %v1131_v9  ;;  %203 = vmatprep.subr.bf16.mxu1 %v1131_v9 }
  0x10   :  { %v1165_v16 = vrot.slane %v35_v14, %v46_v13  ;;  %v1170_v19 = vrot.slane %v35_v14, %v50_v15  ;;  %v1173_v21 = vrot.slane %v36_v18, %v46_v13  ;;  %v1177_v24 = vrot.slane %v36_v18, %v50_v15  ;;  %v922_v14 = vld [vmem:[%s1375_s0 + $0x10] sm:$0xff] }
  0x12   :  { %120 = vmatpush1.bf16.msra.mxu0 %v1138_v10  ;;  %204 = vmatpush1.bf16.msra.mxu1 %v1138_v10 }
  0x13   :  { %282 = vmatprep.subr.bf16.mxu0 %v1085_v1  ;;  %367 = vmatprep.subr.bf16.mxu1 %v1085_v1 }
  0x15   :  { %146 = vmatmul.mubr.bf16.vlgmr.msra.gmra.mrb[0].mxu0 %v1041_v3 }
  0x16   :  { %283 = vmatpush1.bf16.msra.mxu0 %v1090_v2  ;;  %314 = vmatprep.mubr.bf16.mxu0 %v1041_v3 }
  0x17   :  { %284 = vmatprep.subr.bf16.mxu0 %v1098_v4 }
  0x1a   :  { %285 = vmatpush1.bf16.msra.mxu0 %v1105_v5 }
  0x1b   :  { %286 = vmatprep.subr.bf16.mxu0 %v1112_v6 }
  0x1e   :  { %287 = vmatpush1.bf16.msra.mxu0 %v1124_v8 }
  0x1f   :  { %288 = vmatprep.subr.bf16.mxu0 %v1131_v9 }
  0x22   :  { %289 = vmatpush1.bf16.msra.mxu0 %v1138_v10 }
  0x23   :  { %452 = vmatprep.subr.bf16.mxu0 %v1085_v1 }
  0x88   :  { %v41_v17 = vpop.permute.xlu0 %40 }
  0x89   :  { %v54_v20 = vmul.f32 %v1165_v16, %v41_v17  ;;  %v55_v22 = vmul.f32 %v1170_v19, %v41_v17 }
  0x8b   :  { %v67_v23 = vadd.f32 %v1173_v21, %v54_v20  ;;  %v68_v27 = vadd.f32 %v1177_v24, %v55_v22 }
  0xe8   :  { %v147_v25 = vpop.f32.mrb[0].mxu0 }
  0xe9   :  { %v154_v26 = vadd.f32 %v147_v25, %v67_v23  ;;  %v149_v28 = vpop.f32.mrb[1].mxu0 }
  0xea   :  { %v151_v29 = vpop.f32.mrb[2].mxu0  ;;  %v155_v32 = vadd.f32 %v149_v28, %v68_v27 }
  0xeb   :  { %v156_v30 = vmul.f32 0.5, %v154_v26  ;;  %v152_v31 = vpop.f32.mrb[3].mxu0 }
  0xec   :  { %v161_v38 = vmul.f32 0.5, %v155_v32 }
  0xed   :  { %953 = vtanh.f32 %v156_v30 }
  0xee   :  { %955 = vtanh.f32 %v155_v32 }
  0xef   :  { %957 = vtanh.f32 %v161_v38 }
  0xf7   :  { %v954_v33 = vpop.eup %953 }
  0xf8   :  { %v158_v34 = vmul.f32 0.5, %v954_v33  ;;  %v956_v36 = vpop.eup %955 }
  0xf9   :  { %v958_v42 = vpop.eup %957 }
  0xfa   :  { %v159_v35 = vadd.f32 0.5, %v158_v34  ;;  %v163_v43 = vmul.f32 0.5, %v958_v42 }
  0xfc   :  { %v166_v37 = vmul.f32 %v956_v36, %v159_v35  ;;  %v165_v39 = vmul.f32 0.0, %v159_v35  ;;  %v164_v44 = vadd.f32 0.5, %v163_v43 }
  0xfe   :  { %168 = vrot.lane.b32.xlu0 %v166_v37, %s1042_s1 }
 0x170   :  { %v169_v40 = vpop.permute.xlu0 %168 }
 0x171   :  { %v171_v41 = vadd.f32 %v169_v40, %v165_v39 }
 0x173   :  { %959 = vtanh.f32 %v171_v41 }
 0x17d   :  { %v960_v45 = vpop.eup %959 }
 0x17e   :  { %v1181_v46 = vmul.f32 %v960_v45, %v164_v44 }
 0x180   :  { %v190_v47 = vpack.c.bf16 %v1181_v46, %v1181_v46 }
 0x182   :  { %192 = vrot.lane.b32.xlu1 %v190_v47, %s1042_s1 }
 0x186   :  { %183 = vperm.xlu1 %940, %v920_v48   ;;  %v924_v48 = vld [vmem:[%s1375_s0 + $0x18] sm:$0xff] }
 0x1f4   :  { %v193_v49 = vpop.permute.xlu1 %192 }
 0x1f5   :  { %921 = vmatmul.mubr.msk.bf16.vlgmr.msra.gmra.mrb[0].mxu1 %vm109_vm0, %v193_v49 }
 0x1f6   :  { %368 = vmatpush1.bf16.msra.mxu1 %v1090_v2  ;;  %399 = vmatprep.mubr.bf16.mxu1 %v1041_v3 }
 0x1f7   :  { %369 = vmatprep.subr.bf16.mxu1 %v1098_v4 }
 0x1fa   :  { %370 = vmatpush1.bf16.msra.mxu1 %v1105_v5 }
 0x1fb   :  { %371 = vmatprep.subr.bf16.mxu1 %v1112_v6 }
 0x1fe   :  { %372 = vmatpush1.bf16.msra.mxu1 %v1124_v8 }
 0x1ff   :  { %373 = vmatprep.subr.bf16.mxu1 %v1131_v9 }
 0x202   :  { %374 = vmatpush1.bf16.msra.mxu1 %v1138_v10 }
 0x203   :  { %537 = vmatprep.subr.bf16.mxu1 %v1085_v1 }
 0x205   :  { %v184_v50 = vpop.permute.xlu1 %183 }
 0x206   :  { %v186_v51 = vmul.f32 %v184_v50, %v1165_v16  ;;  %v187_v52 = vmul.f32 %v184_v50, %v1170_v19 }
 0x208   :  { %v188_v53 = vadd.f32 %v186_v51, %v1173_v21  ;;  %v189_v56 = vadd.f32 %v187_v52, %v1177_v24 }
 0x2c8   :  { %v231_v54 = vpop.f32.mrb[0].mxu1 }
 0x2c9   :  { %v238_v55 = vadd.f32 %v231_v54, %v188_v53  ;;  %v233_v57 = vpop.f32.mrb[1].mxu1 }
 0x2ca   :  { %v235_v58 = vpop.f32.mrb[2].mxu1  ;;  %v239_v61 = vadd.f32 %v233_v57, %v189_v56 }
 0x2cb   :  { %v240_v59 = vmul.f32 0.5, %v238_v55  ;;  %v236_v60 = vpop.f32.mrb[3].mxu1 }
 0x2cc   :  { %v245_v15 = vmul.f32 0.5, %v239_v61 }
 0x2cd   :  { %961 = vtanh.f32 %v240_v59 }
 0x2ce   :  { %963 = vtanh.f32 %v239_v61 }
 0x2cf   :  { %965 = vtanh.f32 %v245_v15 }
 0x2d7   :  { %v962_v62 = vpop.eup %961 }
 0x2d8   :  { %v242_v63 = vmul.f32 0.5, %v962_v62  ;;  %v964_v7 = vpop.eup %963 }
 0x2d9   :  { %v966_v22 = vpop.eup %965 }
 0x2da   :  { %v243_v0 = vadd.f32 0.5, %v242_v63  ;;  %v247_v23 = vmul.f32 0.5, %v966_v22 }
 0x2dc   :  { %v250_v13 = vmul.f32 %v964_v7, %v243_v0  ;;  %v249_v17 = vmul.f32 %v243_v0, %v171_v41  ;;  %v248_v25 = vadd.f32 0.5, %v247_v23 }
 0x2de   :  { %252 = vrot.lane.b32.xlu0 %v250_v13, %s1042_s1 }
 0x2e2   :  { %268 = vperm.xlu0 %939, %v922_v14  }
 0x350   :  { %v253_v18 = vpop.permute.xlu0 %252 }
 0x351   :  { %v255_v20 = vadd.f32 %v253_v18, %v249_v17 }
 0x353   :  { %967 = vtanh.f32 %v255_v20 }
 0x35d   :  { %v968_v26 = vpop.eup %967 }
 0x35e   :  { %v1207_v27 = vmul.f32 %v968_v26, %v248_v25 }
 0x360   :  { %v275_v28 = vpack.c.bf16 %v1207_v27, %v1207_v27 }
 0x361   :  { %v269_v30 = vpop.permute.xlu0 %268 }
 0x362   :  { %277 = vrot.lane.b32.xlu1 %v275_v28, %s1042_s1  ;;  %v271_v31 = vmul.f32 %v269_v30, %v1165_v16  ;;  %v272_v32 = vmul.f32 %v269_v30, %v1170_v19  ;;  %v926_v28 = vld [vmem:[%s1375_s0 + $0x20] sm:$0xff] }
 0x364   :  { %v273_v33 = vadd.f32 %v271_v31, %v1173_v21  ;;  %v274_v39 = vadd.f32 %v272_v32, %v1177_v24 }
 0x3d4   :  { %v278_v29 = vpop.permute.xlu1 %277 }
 0x3d5   :  { %923 = vmatmul.mubr.msk.bf16.vlgmr.msra.gmra.mrb[4].mxu0 %vm109_vm0, %v278_v29 }
 0x3d6   :  { %453 = vmatpush1.bf16.msra.mxu0 %v1090_v2  ;;  %484 = vmatprep.mubr.bf16.mxu0 %v1041_v3 }
 0x3d7   :  { %454 = vmatprep.subr.bf16.mxu0 %v1098_v4 }
 0x3da   :  { %455 = vmatpush1.bf16.msra.mxu0 %v1105_v5 }
 0x3db   :  { %456 = vmatprep.subr.bf16.mxu0 %v1112_v6 }
 0x3de   :  { %457 = vmatpush1.bf16.msra.mxu0 %v1124_v8 }
 0x3df   :  { %458 = vmatprep.subr.bf16.mxu0 %v1131_v9 }
 0x3e2   :  { %459 = vmatpush1.bf16.msra.mxu0 %v1138_v10 }
 0x3e3   :  { %622 = vmatprep.subr.bf16.mxu0 %v1085_v1 }
 0x4a8   :  { %v316_v34 = vpop.f32.mrb[4].mxu0 }
 0x4a9   :  { %v323_v35 = vadd.f32 %v316_v34, %v273_v33  ;;  %v318_v36 = vpop.f32.mrb[5].mxu0 }
 0x4aa   :  { %v320_v37 = vpop.f32.mrb[6].mxu0  ;;  %v324_v41 = vadd.f32 %v318_v36, %v274_v39 }
 0x4ab   :  { %v325_v38 = vmul.f32 0.5, %v323_v35  ;;  %v321_v40 = vpop.f32.mrb[7].mxu0 }
 0x4ac   :  { %v330_v49 = vmul.f32 0.5, %v324_v41 }
 0x4ad   :  { %969 = vtanh.f32 %v325_v38 }
 0x4ae   :  { %971 = vtanh.f32 %v324_v41 }
 0x4af   :  { %973 = vtanh.f32 %v330_v49 }
 0x4b7   :  { %v970_v42 = vpop.eup %969 }
 0x4b8   :  { %v327_v43 = vmul.f32 0.5, %v970_v42  ;;  %v972_v45 = vpop.eup %971 }
 0x4b9   :  { %v974_v53 = vpop.eup %973 }
 0x4ba   :  { %v328_v44 = vadd.f32 0.5, %v327_v43  ;;  %v332_v54 = vmul.f32 0.5, %v974_v53 }
 0x4bc   :  { %v335_v47 = vmul.f32 %v972_v45, %v328_v44  ;;  %v334_v50 = vmul.f32 %v328_v44, %v255_v20  ;;  %v333_v55 = vadd.f32 0.5, %v332_v54 }
 0x4be   :  { %337 = vrot.lane.b32.xlu1 %v335_v47, %s1042_s1 }
 0x4c2   :  { %353 = vperm.xlu1 %940, %v924_v48  }
 0x530   :  { %v338_v51 = vpop.permute.xlu1 %337 }
 0x531   :  { %v340_v52 = vadd.f32 %v338_v51, %v334_v50 }
 0x533   :  { %975 = vtanh.f32 %v340_v52 }
 0x53d   :  { %v976_v56 = vpop.eup %975 }
 0x53e   :  { %v1230_v57 = vmul.f32 %v976_v56, %v333_v55 }
 0x540   :  { %v360_v58 = vpack.c.bf16 %v1230_v57, %v1230_v57 }
 0x541   :  { %v354_v60 = vpop.permute.xlu1 %353 }
 0x542   :  { %362 = vrot.lane.b32.xlu0 %v360_v58, %s1042_s1  ;;  %v356_v61 = vmul.f32 %v354_v60, %v1165_v16  ;;  %v357_v62 = vmul.f32 %v354_v60, %v1170_v19 }
 0x544   :  { %v358_v63 = vadd.f32 %v356_v61, %v1173_v21  ;;  %v359_v17 = vadd.f32 %v357_v62, %v1177_v24 }
 0x5b4   :  { %v363_v59 = vpop.permute.xlu0 %362 }
 0x5b5   :  { %925 = vmatmul.mubr.msk.bf16.vlgmr.msra.gmra.mrb[4].mxu1 %vm109_vm0, %v363_v59  ;;  %v928_v59 = vld [vmem:[%s1375_s0 + $0x28] sm:$0xff] }
 0x5b6   :  { %538 = vmatpush1.bf16.msra.mxu1 %v1090_v2  ;;  %569 = vmatprep.mubr.bf16.mxu1 %v1041_v3 }
 0x5b7   :  { %539 = vmatprep.subr.bf16.mxu1 %v1098_v4 }
 0x5ba   :  { %540 = vmatpush1.bf16.msra.mxu1 %v1105_v5 }
 0x5bb   :  { %541 = vmatprep.subr.bf16.mxu1 %v1112_v6 }
 0x5be   :  { %542 = vmatpush1.bf16.msra.mxu1 %v1124_v8 }
 0x5bf   :  { %543 = vmatprep.subr.bf16.mxu1 %v1131_v9 }
 0x5c2   :  { %544 = vmatpush1.bf16.msra.mxu1 %v1138_v10 }
 0x5c3   :  { %707 = vmatprep.subr.bf16.mxu1 %v1085_v1 }
 0x688   :  { %v401_v0 = vpop.f32.mrb[4].mxu1 }
 0x689   :  { %v408_v7 = vadd.f32 %v401_v0, %v358_v63  ;;  %v403_v13 = vpop.f32.mrb[5].mxu1 }
 0x68a   :  { %v405_v14 = vpop.f32.mrb[6].mxu1  ;;  %v409_v20 = vadd.f32 %v403_v13, %v359_v17 }
 0x68b   :  { %v410_v15 = vmul.f32 0.5, %v408_v7  ;;  %v406_v18 = vpop.f32.mrb[7].mxu1 }
 0x68c   :  { %v415_v29 = vmul.f32 0.5, %v409_v20 }
 0x68d   :  { %977 = vtanh.f32 %v410_v15 }
 0x68e   :  { %979 = vtanh.f32 %v409_v20 }
 0x68f   :  { %981 = vtanh.f32 %v415_v29 }
 0x697   :  { %v978_v22 = vpop.eup %977 }
 0x698   :  { %v412_v1 = vmul.f32 0.5, %v978_v22  ;;  %v980_v25 = vpop.eup %979 }
 0x699   :  { %v982_v33 = vpop.eup %981 }
 0x69a   :  { %v413_v23 = vadd.f32 0.5, %v412_v1  ;;  %v417_v34 = vmul.f32 0.5, %v982_v33 }
 0x69c   :  { %v420_v26 = vmul.f32 %v980_v25, %v413_v23  ;;  %v419_v30 = vmul.f32 %v413_v23, %v340_v52  ;;  %v418_v35 = vadd.f32 0.5, %v417_v34 }
 0x69e   :  { %422 = vrot.lane.b32.xlu0 %v420_v26, %s1042_s1 }
 0x6a2   :  { %438 = vperm.xlu0 %939, %v926_v28  }
 0x710   :  { %v423_v31 = vpop.permute.xlu0 %422 }
 0x711   :  { %v425_v32 = vadd.f32 %v423_v31, %v419_v30  ;;  %v930_v31 = vld [vmem:[%s1375_s0 + $0x30] sm:$0xff] }
 0x713   :  { %983 = vtanh.f32 %v425_v32 }
 0x71d   :  { %v984_v36 = vpop.eup %983 }
 0x71e   :  { %v1253_v37 = vmul.f32 %v984_v36, %v418_v35 }
 0x720   :  { %v445_v38 = vpack.c.bf16 %v1253_v37, %v1253_v37 }
 0x721   :  { %v439_v40 = vpop.permute.xlu0 %438 }
 0x722   :  { %447 = vrot.lane.b32.xlu1 %v445_v38, %s1042_s1  ;;  %v441_v41 = vmul.f32 %v439_v40, %v1165_v16  ;;  %v442_v42 = vmul.f32 %v439_v40, %v1170_v19 }
 0x724   :  { %v443_v43 = vadd.f32 %v441_v41, %v1173_v21  ;;  %v444_v50 = vadd.f32 %v442_v42, %v1177_v24 }
 0x794   :  { %v448_v39 = vpop.permute.xlu1 %447 }
 0x795   :  { %927 = vmatmul.mubr.msk.bf16.vlgmr.msra.gmra.mrb[8].mxu0 %vm109_vm0, %v448_v39 }
 0x796   :  { %623 = vmatpush1.bf16.msra.mxu0 %v1090_v2  ;;  %654 = vmatprep.mubr.bf16.mxu0 %v1041_v3 }
 0x797   :  { %624 = vmatprep.subr.bf16.mxu0 %v1098_v4 }
 0x79a   :  { %625 = vmatpush1.bf16.msra.mxu0 %v1105_v5 }
 0x79b   :  { %626 = vmatprep.subr.bf16.mxu0 %v1112_v6 }
 0x79e   :  { %627 = vmatpush1.bf16.msra.mxu0 %v1124_v8 }
 0x79f   :  { %628 = vmatprep.subr.bf16.mxu0 %v1131_v9 }
 0x7a2   :  { %629 = vmatpush1.bf16.msra.mxu0 %v1138_v10 }
 0x868   :  { %v486_v44 = vpop.f32.mrb[8].mxu0 }
 0x869   :  { %v493_v45 = vadd.f32 %v486_v44, %v443_v43  ;;  %v488_v47 = vpop.f32.mrb[9].mxu0 }
 0x86a   :  { %v490_v48 = vpop.f32.mrb[10].mxu0  ;;  %v494_v52 = vadd.f32 %v488_v47, %v444_v50 }
 0x86b   :  { %v495_v49 = vmul.f32 0.5, %v493_v45  ;;  %v491_v51 = vpop.f32.mrb[11].mxu0 }
 0x86c   :  { %v500_v60 = vmul.f32 0.5, %v494_v52 }
 0x86d   :  { %985 = vtanh.f32 %v495_v49 }
 0x86e   :  { %987 = vtanh.f32 %v494_v52 }
 0x86f   :  { %989 = vtanh.f32 %v500_v60 }
 0x877   :  { %v986_v53 = vpop.eup %985 }
 0x878   :  { %v497_v54 = vmul.f32 0.5, %v986_v53  ;;  %v988_v56 = vpop.eup %987 }
 0x879   :  { %v990_v0 = vpop.eup %989 }
 0x87a   :  { %v498_v55 = vadd.f32 0.5, %v497_v54  ;;  %v502_v7 = vmul.f32 0.5, %v990_v0 }
 0x87c   :  { %v505_v58 = vmul.f32 %v988_v56, %v498_v55  ;;  %v504_v61 = vmul.f32 %v498_v55, %v425_v32  ;;  %v503_v13 = vadd.f32 0.5, %v502_v7 }
 0x87e   :  { %507 = vrot.lane.b32.xlu1 %v505_v58, %s1042_s1 }
 0x882   :  { %523 = vperm.xlu1 %940, %v928_v59  }
 0x8f0   :  { %v508_v62 = vpop.permute.xlu1 %507 }
 0x8f1   :  { %v510_v63 = vadd.f32 %v508_v62, %v504_v61 }
 0x8f3   :  { %991 = vtanh.f32 %v510_v63 }
 0x8fd   :  { %v992_v14 = vpop.eup %991 }
 0x8fe   :  { %v1275_v15 = vmul.f32 %v992_v14, %v503_v13 }
 0x900   :  { %v530_v17 = vpack.c.bf16 %v1275_v15, %v1275_v15 }
 0x901   :  { %v524_v20 = vpop.permute.xlu1 %523 }
 0x902   :  { %532 = vrot.lane.b32.xlu0 %v530_v17, %s1042_s1  ;;  %v526_v22 = vmul.f32 %v524_v20, %v1165_v16  ;;  %v527_v1 = vmul.f32 %v524_v20, %v1170_v19 }
 0x974   :  { %v533_v18 = vpop.permute.xlu0 %532 }
 0x975   :  { %929 = vmatmul.mubr.msk.bf16.vlgmr.msra.gmra.mrb[8].mxu1 %vm109_vm0, %v533_v18 }
 0x976   :  { %708 = vmatpush1.bf16.msra.mxu1 %v1090_v2  ;;  %739 = vmatprep.mubr.bf16.mxu1 %v1041_v3  ;;  %v528_v2 = vadd.f32 %v526_v22, %v1173_v21 }
 0x977   :  { %709 = vmatprep.subr.bf16.mxu1 %v1098_v4 }
 0x97a   :  { %710 = vmatpush1.bf16.msra.mxu1 %v1105_v5 }
 0x97b   :  { %711 = vmatprep.subr.bf16.mxu1 %v1112_v6  ;;  %v529_v6 = vadd.f32 %v527_v1, %v1177_v24 }
 0x97e   :  { %712 = vmatpush1.bf16.msra.mxu1 %v1124_v8 }
 0x97f   :  { %713 = vmatprep.subr.bf16.mxu1 %v1131_v9 }
 0x982   :  { %714 = vmatpush1.bf16.msra.mxu1 %v1138_v10 }
 0xa48   :  { %v571_v3 = vpop.f32.mrb[8].mxu1 }
 0xa49   :  { %v578_v23 = vadd.f32 %v571_v3, %v528_v2  ;;  %v573_v4 = vpop.f32.mrb[9].mxu1 }
 0xa4a   :  { %v575_v25 = vpop.f32.mrb[10].mxu1  ;;  %v579_v8 = vadd.f32 %v573_v4, %v529_v6  ;;  %v1325_v4 = vld [vmem:[%s1379_s4] ss:$0 sm:$0xff]  ;;  %s1043_s4 = smov [#allocation4]  }
 0xa4b   :  { %v580_v5 = vmul.f32 0.5, %v578_v23  ;;  %v576_v26 = vpop.f32.mrb[11].mxu1  ;;  %s904_s8 = sshll.u32 %s1043_s4, 4  ;;  %s905_s8 = int_to_ptr.vmem [resolvable:$true] %s904_s8 }
 0xa4c   :  { %v585_v32 = vmul.f32 0.5, %v579_v8  ;;  %s1017_s9 = scalar_lea.vmem %s905_s8, 128  ;;  %p1022_p1 = scmp.lt.s32.totalorder %s905_s8, %s905_s8 }
 0xa4d   :  { %993 = vtanh.f32 %v580_v5  ;;  %p1018_p0 = scmp.ne.s32.totalorder %s905_s8, %s1017_s9  ;;  %p1023_p2 = scmp.lt.s32.totalorder %s1017_s9, %s1017_s9 }
 0xa4e   :  { %995 = vtanh.f32 %v579_v8 }
 0xa4f   :  { %997 = vtanh.f32 %v585_v32  ;;  %p1024_p3 = por %p1023_p2, %p1022_p1 }
 0xa51   :  { %p1025_p4 = pnand %p1024_p3, %p1018_p0 }
 0xa57   :  { %v994_v9 = vpop.eup %993 }
 0xa58   :  { %v582_v10 = vmul.f32 0.5, %v994_v9  ;;  %v996_v29 = vpop.eup %995 }
 0xa59   :  { %v998_v36 = vpop.eup %997 }
 0xa5a   :  { %v583_v28 = vadd.f32 0.5, %v582_v10  ;;  %v587_v38 = vmul.f32 0.5, %v998_v36 }
 0xa5c   :  { %v590_v30 = vmul.f32 %v996_v29, %v583_v28  ;;  %v589_v33 = vmul.f32 %v583_v28, %v510_v63  ;;  %v588_v39 = vadd.f32 0.5, %v587_v38  ;;  %v932_v63 = vld [vmem:[%s1375_s0 + $0x38] sm:$0xff] }
 0xa5e   :  { %592 = vrot.lane.b32.xlu0 %v590_v30, %s1042_s1 }
 0xa62   :  { %608 = vperm.xlu0 %939, %v930_v31  }
 0xad0   :  { %v593_v34 = vpop.permute.xlu0 %592 }
 0xad1   :  { %v595_v35 = vadd.f32 %v593_v34, %v589_v33 }
 0xad3   :  { %999 = vtanh.f32 %v595_v35 }
 0xadd   :  { %v1000_v40 = vpop.eup %999 }
 0xade   :  { %v1297_v41 = vmul.f32 %v1000_v40, %v588_v39 }
 0xae0   :  { %v615_v42 = vpack.c.bf16 %v1297_v41, %v1297_v41 }
 0xae1   :  { %v609_v44 = vpop.permute.xlu0 %608 }
 0xae2   :  { %617 = vrot.lane.b32.xlu1 %v615_v42, %s1042_s1  ;;  %v611_v45 = vmul.f32 %v609_v44, %v1165_v16  ;;  %v612_v47 = vmul.f32 %v609_v44, %v1170_v19 }
 0xae4   :  { %v613_v48 = vadd.f32 %v611_v45, %v1173_v21  ;;  %v614_v54 = vadd.f32 %v612_v47, %v1177_v24 }
 0xb54   :  { %v618_v43 = vpop.permute.xlu1 %617 }
 0xb55   :  { %931 = vmatmul.mubr.msk.bf16.vlgmr.msra.gmra.mrb[12].mxu0 %vm109_vm0, %v618_v43 }
 0xc28   :  { %v656_v49 = vpop.f32.mrb[12].mxu0 }
 0xc29   :  { %v663_v50 = vadd.f32 %v656_v49, %v613_v48  ;;  %v658_v51 = vpop.f32.mrb[13].mxu0 }
 0xc2a   :  { %v660_v52 = vpop.f32.mrb[14].mxu0  ;;  %v664_v56 = vadd.f32 %v658_v51, %v614_v54 }
 0xc2b   :  { %v665_v53 = vmul.f32 0.5, %v663_v50  ;;  %v661_v55 = vpop.f32.mrb[15].mxu0 }
 0xc2c   :  { %v670_v0 = vmul.f32 0.5, %v664_v56 }
 0xc2d   :  { %1001 = vtanh.f32 %v665_v53 }
 0xc2e   :  { %1003 = vtanh.f32 %v664_v56 }
 0xc2f   :  { %1005 = vtanh.f32 %v670_v0 }
 0xc37   :  { %v1002_v58 = vpop.eup %1001 }
 0xc38   :  { %v667_v59 = vmul.f32 0.5, %v1002_v58  ;;  %v1004_v61 = vpop.eup %1003 }
 0xc39   :  { %v1006_v17 = vpop.eup %1005 }
 0xc3a   :  { %v668_v60 = vadd.f32 0.5, %v667_v59  ;;  %v672_v18 = vmul.f32 0.5, %v1006_v17  ;;  %v935_v17 = vld [vmem:[#allocation3] ss:$0 sm:$0xff] }
 0xc3c   :  { %v675_v62 = vmul.f32 %v1004_v61, %v668_v60  ;;  %v674_v7 = vmul.f32 %v668_v60, %v595_v35  ;;  %v673_v20 = vadd.f32 0.5, %v672_v18 }
 0xc3e   :  { %677 = vrot.lane.b32.xlu1 %v675_v62, %s1042_s1 }
 0xc42   :  { %693 = vperm.xlu1 %940, %v932_v63  }
 0xc46   :  { %175 = vrot.lane.b32.xlu1 %v1181_v46, %s1042_s1 }
 0xc4a   :  { %344 = vrot.lane.b32.xlu1 %v1230_v57, %s1042_s1 }
 0xc4e   :  { %514 = vrot.lane.b32.xlu1 %v1275_v15, %s1042_s1 }
 0xcb0   :  { %v678_v13 = vpop.permute.xlu1 %677 }
 0xcb1   :  { %v680_v14 = vadd.f32 %v678_v13, %v674_v7 }
 0xcb3   :  { %1007 = vtanh.f32 %v680_v14 }
 0xcbd   :  { %v1008_v22 = vpop.eup %1007 }
 0xcbe   :  { %v682_v1 = vmul.f32 %v1008_v22, %v673_v20 }
 0xcc0   :  { %684 = vrot.lane.b32.xlu1 %v682_v1, %s1042_s1  ;;  %v700_v46 = vpack.c.bf16 %v682_v1, %v682_v1 }
 0xcc1   :  { %v694_v2 = vpop.permute.xlu1 %693 }
 0xcc2   :  { %702 = vrot.lane.b32.xlu0 %v700_v46, %s1042_s1  ;;  %v696_v8 = vmul.f32 %v694_v2, %v1165_v16  ;;  %v697_v9 = vmul.f32 %v694_v2, %v1170_v19 }
 0xcc4   :  { %v698_v10 = vadd.f32 %v696_v8, %v1173_v21  ;;  %v699_v29 = vadd.f32 %v697_v9, %v1177_v24 }
 0xcc5   :  { %v176_v57 = vpop.permute.xlu1 %175 }
 0xcc6   :  { %178 = vst.msk [vmem:[#allocation2] sm:$0xff] %vm109_vm0, %v176_v57 }
 0xcc9   :  { %v345_v15 = vpop.permute.xlu1 %344 }
 0xcca   :  { %348 = vst.msk [vmem:[#allocation2 + $0x10] sm:$0xff] %vm109_vm0, %v345_v15 }
 0xccd   :  { %v515_v3 = vpop.permute.xlu1 %514  ;;  %v774_v23 = vld [vmem:[#allocation2] sm:$0xff] }
 0xcce   :  { %518 = vst.msk [vmem:[#allocation2 + $0x20] sm:$0xff] %vm109_vm0, %v515_v3  ;;  %v789_v25 = vmul.f32 %v1325_v4, %v774_v23  ;;  %v848_v3 = vand.u32 127, %v44_v11 }
 0xcd0   :  { %v797_v5 = vsel %vm109_vm0, %v789_v25, 0.0 }
 0xcd1   :  { %v776_v58 = vld [vmem:[#allocation2 + $0x10] sm:$0xff] }
 0xcd2   :  { %v791_v60 = vmul.f32 %v1325_v4, %v776_v58 }
 0xcd4   :  { %v803_v62 = vsel %vm109_vm0, %v791_v60, 0.0 }
 0xcd5   :  { %v778_v61 = vld [vmem:[#allocation2 + $0x20] sm:$0xff] }
 0xcd6   :  { %v793_v63 = vmul.f32 %v1325_v4, %v778_v61 }
 0xcd8   :  { %v809_v7 = vsel %vm109_vm0, %v793_v63, 0.0 }
 0xce4   :  { %798 = vadd.xlane.f32.xlu1 %v797_v5  ;;  %v851_v5 = vsub.s32 %v848_v3, %v1158_v12 }
 0xd32   :  { %v685_v6 = vpop.permute.xlu1 %684 }
 0xd33   :  { %688 = vst.msk [vmem:[#allocation2 + $0x30] sm:$0xff] %vm109_vm0, %v685_v6 }
 0xd34   :  { %v703_v26 = vpop.permute.xlu0 %702 }
 0xd35   :  { %933 = vmatmul.mubr.msk.bf16.vlgmr.msra.gmra.mrb[12].mxu1 %vm109_vm0, %v703_v26 }
 0xd3a   :  { %v780_v0 = vld [vmem:[#allocation2 + $0x30] sm:$0xff] }
 0xd3b   :  { %v795_v13 = vmul.f32 %v1325_v4, %v780_v0 }
 0xd71   :  { %v799_v25 = vpop.xlane.xlu1 %798 }
 0xe08   :  { %v741_v28 = vpop.f32.mrb[12].mxu1 }
 0xe09   :  { %v748_v30 = vadd.f32 %v741_v28, %v698_v10  ;;  %v743_v31 = vpop.f32.mrb[13].mxu1 }
 0xe0a   :  { %v749_v32 = vadd.f32 %v743_v31, %v699_v29  ;;  %v745_v33 = vpop.f32.mrb[14].mxu1 }
 0xe0b   :  { %v750_v34 = vmul.f32 0.5, %v748_v30  ;;  %v746_v35 = vpop.f32.mrb[15].mxu1 }
 0xe0c   :  { %v755_v19 = vmul.f32 0.5, %v749_v32 }
 0xe0d   :  { %1009 = vtanh.f32 %v750_v34 }
 0xe0e   :  { %1011 = vtanh.f32 %v749_v32 }
 0xe0f   :  { %1013 = vtanh.f32 %v755_v19 }
 0xe17   :  { %v1010_v36 = vpop.eup %1009 }
 0xe18   :  { %v752_v38 = vmul.f32 0.5, %v1010_v36  ;;  %v1012_v40 = vpop.eup %1011 }
 0xe19   :  { %v1014_v44 = vpop.eup %1013 }
 0xe1a   :  { %v753_v39 = vadd.f32 0.5, %v752_v38  ;;  %v757_v45 = vmul.f32 0.5, %v1014_v44 }
 0xe1c   :  { %v760_v16 = vmul.f32 %v1012_v40, %v753_v39  ;;  %v759_v21 = vmul.f32 %v753_v39, %v680_v14  ;;  %v758_v48 = vadd.f32 0.5, %v757_v45  ;;  %v815_v14 = vsel %vm109_vm0, %v795_v13, 0.0 }
 0xe1e   :  { %762 = vrot.lane.b32.xlu0 %v760_v16, %s1042_s1 }
 0xe22   :  { %259 = vrot.lane.b32.xlu0 %v1207_v27, %s1042_s1 }
 0xe26   :  { %429 = vrot.lane.b32.xlu0 %v1253_v37, %s1042_s1 }
 0xe2a   :  { %599 = vrot.lane.b32.xlu0 %v1297_v41, %s1042_s1 }
 0xe90   :  { %v763_v24 = vpop.permute.xlu0 %762 }
 0xe91   :  { %v765_v42 = vadd.f32 %v763_v24, %v759_v21 }
 0xe93   :  { %1015 = vtanh.f32 %v765_v42 }
 0xe94   :  { %v260_v43 = vpop.permute.xlu0 %259 }
 0xe95   :  { %263 = vst.msk [vmem:[#allocation2 + $0x8] sm:$0xff] %vm109_vm0, %v260_v43 }
 0xe98   :  { %v430_v47 = vpop.permute.xlu0 %429 }
 0xe99   :  { %433 = vst.msk [vmem:[#allocation2 + $0x18] sm:$0xff] %vm109_vm0, %v430_v47 }
 0xe9c   :  { %v600_v27 = vpop.permute.xlu0 %599  ;;  %v775_v55 = vld [vmem:[#allocation2 + $0x8] sm:$0xff] }
 0xe9d   :  { %v1016_v37 = vpop.eup %1015  ;;  %603 = vst.msk [vmem:[#allocation2 + $0x28] sm:$0xff] %vm109_vm0, %v600_v27  ;;  %v790_v56 = vmul.f32 %v1325_v4, %v775_v55 }
 0xe9e   :  { %v767_v41 = vmul.f32 %v1016_v37, %v758_v48 }
 0xe9f   :  { %v800_v59 = vsel %vm109_vm0, %v790_v56, 0.0 }
 0xea0   :  { %769 = vrot.lane.b32.xlu0 %v767_v41, %s1042_s1  ;;  %v777_v49 = vld [vmem:[#allocation2 + $0x18] sm:$0xff] }
 0xea1   :  { %v792_v50 = vmul.f32 %v1325_v4, %v777_v49 }
 0xea3   :  { %v806_v51 = vsel %vm109_vm0, %v792_v50, 0.0 }
 0xea4   :  { %807 = vadd.xlane.f32.xlu1 %v806_v51  ;;  %v779_v52 = vld [vmem:[#allocation2 + $0x28] sm:$0xff] }
 0xea5   :  { %v794_v53 = vmul.f32 %v1325_v4, %v779_v52 }
 0xea7   :  { %v812_v54 = vsel %vm109_vm0, %v794_v53, 0.0 }
 0xea8   :  { %813 = vadd.xlane.f32.xlu1 %v812_v54 }
 0xebf   :  { %801 = vadd.xlane.f32.xlu0 %v800_v59 }
 0xec3   :  { %804 = vadd.xlane.f32.xlu0 %v803_v62 }
 0xec7   :  { %810 = vadd.xlane.f32.xlu0 %v809_v7 }
 0xecb   :  { %816 = vadd.xlane.f32.xlu0 %v815_v14 }
 0xee1   :  { %828 = vperm.xlu0 %939, %v935_v17  }
 0xf12   :  { %v770_v18 = vpop.permute.xlu0 %769 }
 0xf13   :  { %773 = vst.msk [vmem:[#allocation2 + $0x38] sm:$0xff] %vm109_vm0, %v770_v18 }
 0xf1a   :  { %v781_v20 = vld [vmem:[#allocation2 + $0x38] sm:$0xff] }
 0xf1b   :  { %v796_v22 = vmul.f32 %v1325_v4, %v781_v20 }
 0xf1d   :  { %v818_v1 = vsel %vm109_vm0, %v796_v22, 0.0 }
 0xf1e   :  { %819 = vadd.xlane.f32.xlu1 %v818_v1 }
 0xf31   :  { %v808_v4 = vpop.xlane.xlu1 %807 }
 0xf35   :  { %v814_v11 = vpop.xlane.xlu1 %813 }
 0xf4c   :  { %v802_v46 = vpop.xlane.xlu0 %801 }
 0xf50   :  { %v805_v2 = vpop.xlane.xlu0 %804 }
 0xf54   :  { %v811_v57 = vpop.xlane.xlu0 %810 }
 0xf58   :  { %v817_v15 = vpop.xlane.xlu0 %816 }
 0xf60   :  { %v829_v23 = vpop.permute.xlu0 %828 }
 0xf61   :  { %v831_v6 = vadd.f32 %v829_v23, %v799_v25  ;;  %v832_v26 = vadd.f32 %v829_v23, %v802_v46  ;;  %v833_v8 = vadd.f32 %v829_v23, %v805_v2  ;;  %v834_v29 = vadd.f32 %v829_v23, %v808_v4 }
 0xf62   :  { %v835_v31 = vadd.f32 %v829_v23, %v811_v57  ;;  %v836_v34 = vadd.f32 %v829_v23, %v814_v11  ;;  %v837_v36 = vadd.f32 %v829_v23, %v817_v15 }
 0xf63   :  { %v852_v9 = vrot.slane %v831_v6, %v851_v5  ;;  %v856_v10 = vrot.slane %v832_v26, %v851_v5  ;;  %v860_v28 = vrot.slane %v833_v8, %v851_v5  ;;  %v864_v33 = vrot.slane %v834_v29, %v851_v5 }
 0xf64   :  { %v868_v12 = vrot.slane %v835_v31, %v851_v5  ;;  %v872_v39 = vrot.slane %v836_v34, %v851_v5  ;;  %v876_v21 = vrot.slane %v837_v36, %v851_v5 }
 0xf65   :  { %v882_v30 = vsel %vm881_vm1, %v856_v10, %v852_v9 }
 0xf66   :  { %v884_v32 = vsel %vm883_vm2, %v860_v28, %v882_v30 }
 0xf67   :  { %v886_v35 = vsel %vm885_vm3, %v864_v33, %v884_v32 }
 0xf68   :  { %v888_v38 = vsel %vm887_vm4, %v868_v12, %v886_v35 }
 0xf69   :  { %v890_v19 = vsel %vm889_vm5, %v872_v39, %v888_v38 }
 0xf6a   :  { %v892_v42 = vsel %vm891_vm6, %v876_v21, %v890_v19 }
 0xfab   :  { %v820_v40 = vpop.xlane.xlu1 %819 }
 0xfac   :  { %v838_v16 = vadd.f32 %v829_v23, %v820_v40 }
 0xfae   :  { %v880_v24 = vrot.slane %v838_v16, %v851_v5 }
 0xfb0   :  { %v894_v43 = vsel %vm893_vm7, %v880_v24, %v892_v42 }
 0xfb1   :  { %897 = vst.msk [vmem:[#allocation4] sm:$0xff] %vm896_vm8, %v894_v43 }
 0xfb2   :  { %1028 = shalt.err (!%p1025_p4)
}
 0xfb3   :  { %s1029_s12 = scalar_lea.hbm %s1381_s6, 128 }
 0xfb4   :  { %p1030_p5 = scmp.ne.s32.totalorder %s1381_s6, %s1029_s12  ;;  %p1033_p6 = scmp.lt.u32.totalorder %s1029_s12, %s1381_s6 }
 0xfb6   :  { %p1035_p7 = pnand %p1033_p6, %p1030_p5 }
 0xfb8   :  { %1038 = shalt.err (!%p1035_p7)
}
 0xfb9   :  { %907 = dma.vmem_to_hbm [thread:$0]  %s905_s8, 128, %s1381_s6, [#allocation5]  }
 0xfba   :  { %1039 = dma.done.wait [#allocation5], 128  }
 0xfbb   :  { %1040 = vsyncadd [#allocation5], 4294967168 }
 0xfbc   :  { %911 = vsyncpa [#allocation5], 1 }

</bundles_post_ra>
